<compile_context>
chip_gen: v7x
topology: tpu7x:2x2x1
jax: 0.10.0
libtpu: 0.0.40
codegen_flags: <defaults>
</compile_context>

<pallas_src>
import functools

import jax
import jax.numpy as jnp
from jax import lax
from jax.experimental import pallas as pl
from jax.experimental.pallas import tpu as pltpu

LANE = 128
SUBLANE = 8


def _round_up(x, m):
    return (x + m - 1) // m * m


def _vmem_budget_bytes():
    """Per-generation VMEM cap with headroom for Mosaic-internal scratch."""
    try:
        cap = int(pltpu.get_tpu_info().vmem_capacity_bytes)
    except Exception:
        cap = 64 * 1024 * 1024  # conservative default (v7x physical VMEM)
    return max(16 * 1024 * 1024, (cap * 3) // 4)


def _weight_spec(shape, index_map, single_buffer):
    """BlockSpec for a grid-invariant (weight) operand.

    When requested, single-buffer it via pipeline_mode=pl.Buffered(1): the
    block never changes across the grid, so default double buffering only
    wastes VMEM (w1 alone is ~38 MiB bf16 at production Cin=1024).
    """
    if single_buffer:
        return pl.BlockSpec(shape, index_map, pipeline_mode=pl.Buffered(1))
    return pl.BlockSpec(shape, index_map)


def _fold_bn(w1_hwio, gamma, beta, run_mean, run_var, eps):
    """Fold eval-mode BatchNorm into the 3x3 conv: scale -> weights, keep bias."""
    f32 = jnp.float32
    inv = gamma.astype(f32) / jnp.sqrt(run_var.astype(f32) + eps)        # (C1,)
    bias = beta.astype(f32) - run_mean.astype(f32) * inv                 # (C1,)
    w1 = w1_hwio.astype(f32) * inv[None, None, None, :]                  # (3,3,Cin,C1)
    return w1, bias


def _head_math(col, w1, b, w2, out_dtype):
    """im2col GEMM -> folded-BN bias -> LeakyReLU(0.1) -> 1x1 conv GEMM."""
    acc = jnp.dot(col, w1, preferred_element_type=jnp.float32)           # f32 acc
    h = acc + b
    h = jnp.maximum(h, 0.1 * h)                                          # LeakyReLU
    out = jnp.dot(h.astype(w2.dtype), w2, preferred_element_type=jnp.float32)
    return out.astype(out_dtype)


def _gemm_head_kernel(col_ref, w1_ref, b_ref, w2_ref, o_ref):
    # Small-Cin path: col was packed in the wrapper; pure GEMM pipeline.
    o_ref[0] = _head_math(col_ref[0], w1_ref[...], b_ref[...], w2_ref[...],
                          o_ref.dtype)


def _im2col_head_kernel(xp_ref, w1_ref, b_ref, w2_ref, o_ref, col_ref,
                        *, H, W, Cin_p):
    # Large-Cin path: build the (H*W, 9*Cin_p) im2col matrix directly in a
    # VMEM scratch.  Each tap is stored at a 128-aligned lane offset (no
    # jnp.concatenate, so no ~2x transient), and the horizontal window shift
    # is done once per dx on the whole padded block (3 sublane-shift passes on
    # the XLU, overlapping the MXU, instead of 9 full relayouts).
    xp = xp_ref[0]                                   # (H+2, Wp2, Cin_p) bf16
    for dx in range(3):
        sh = xp[:, dx:dx + W, :]                     # one sublane shift per dx
        for dy in range(3):
            t = dy * 3 + dx                          # matches w1 (dy,dx,cin) order
            tap = sh[dy:dy + H]                      # cheap leading-dim slice
            col_ref[:, pl.ds(t * Cin_p, Cin_p)] = tap.reshape(H * W, Cin_p)
    o_ref[0] = _head_math(col_ref[...], w1_ref[...], b_ref[...], w2_ref[...],
                          o_ref.dtype)


def _small_cin_forward(x_nchw, w1_hwio, gamma, beta, run_mean, run_var, w2_io,
                       num_classes, eps):
    """Cin < 128: wrapper-side im2col, K = round_up(9*Cin, 128) GEMM kernel."""
    B, Cin, H, W = x_nchw.shape
    C1 = w1_hwio.shape[-1]
    C2 = w2_io.shape[-1]
    f32, bf16 = jnp.float32, jnp.bfloat16

    K = 9 * Cin
    Kp = _round_up(K, LANE)          # pad 9*Cin (not Cin) -> no 9x zero blowup
    C1p = _round_up(C1, LANE)
    C2p = _round_up(C2, LANE)

    w1f, bias = _fold_bn(w1_hwio, gamma, beta, run_mean, run_var, eps)
    w1_mat = jnp.pad(w1f.reshape(K, C1),
                     ((0, Kp - K), (0, C1p - C1))).astype(bf16)
    bias_p = jnp.pad(bias, (0, C1p - C1)).reshape(1, C1p)
    w2_mat = jnp.pad(w2_io.astype(f32),
                     ((0, C1p - C1), (0, C2p - C2))).astype(bf16)

    # Wrapper-side im2col (tiny at Cin < 128): NCHW -> NHWC, halo pad, pack
    # the 9 taps on the channel axis in (dy, dx, cin) order to match w1_mat.
    x_nhwc = jnp.transpose(x_nchw, (0, 2, 3, 1))
    x_pad = jnp.pad(x_nhwc, ((0, 0), (1, 1), (1, 1), (0, 0)))
    taps = [x_pad[:, dy:dy + H, dx:dx + W, :]
            for dy in range(3) for dx in range(3)]
    col = jnp.concatenate(taps, axis=-1).reshape(B, H * W, K)

    M = H * W
    TM = min(_round_up(M, SUBLANE), 128)            # M (GEMM rows) tile
    Mp = _round_up(M, TM)
    col = jnp.pad(col, ((0, 0), (0, Mp - M), (0, Kp - K))).astype(bf16)

    grid = (B, Mp // TM)
    flops = 2 * B * H * W * (9 * Cin * C1 + C1 * C2)
    bytes_accessed = int(col.size * 2 + w1_mat.size * 2 + w2_mat.size * 2
                         + bias_p.size * 4 + B * Mp * C2p * 2)
    # Double-buffered streamed blocks + weights + working set (generous).
    blk = 2 * (TM * Kp * 2 + TM * C2p * 2)
    wts = 2 * (Kp * C1p * 2 + C1p * C2p * 2 + C1p * 4)
    wrk = 2 * TM * (Kp * 2 + C1p * 4 + C1p * 2 + C2p * 4)
    vmem_limit = int(min(max(blk + wts + wrk, 8 * 1024 * 1024),
                         _vmem_budget_bytes()))

    def call(single_buffer_weights):
        return pl.pallas_call(
            _gemm_head_kernel,
            out_shape=jax.ShapeDtypeStruct((B, Mp, C2p), bf16),
            grid_spec=pltpu.PrefetchScalarGridSpec(
                num_scalar_prefetch=0,
                grid=grid,
                in_specs=[
                    pl.BlockSpec((1, TM, Kp), lambda b, m: (b, m, 0)),
                    _weight_spec((Kp, C1p), lambda b, m: (0, 0),
                                 single_buffer_weights),
                    _weight_spec((1, C1p), lambda b, m: (0, 0),
                                 single_buffer_weights),
                    _weight_spec((C1p, C2p), lambda b, m: (0, 0),
                                 single_buffer_weights),
                ],
                out_specs=pl.BlockSpec((1, TM, C2p), lambda b, m: (b, m, 0)),
            ),
            compiler_params=pltpu.CompilerParams(
                dimension_semantics=("parallel", "parallel"),
                vmem_limit_bytes=vmem_limit),
            cost_estimate=pl.CostEstimate(
                flops=int(flops), transcendentals=0,
                bytes_accessed=bytes_accessed),
        )(col, w1_mat, bias_p, w2_mat)

    try:
        out = call(single_buffer_weights=True)
    except Exception:
        # pipeline_mode=pl.Buffered not supported by this jax version; fall
        # back to default double-buffered weight blocks.
        out = call(single_buffer_weights=False)

    out = out[:, :M, :C2].astype(f32).reshape(B, H, W, 3, num_classes + 5)
    return jnp.transpose(out, (0, 3, 1, 2, 4))


def _large_cin_forward(x_nchw, w1_hwio, gamma, beta, run_mean, run_var, w2_io,
                       num_classes, eps):
    """Cin >= 128: in-kernel im2col into a VMEM scratch, single wide GEMM."""
    B, Cin, H, W = x_nchw.shape
    C1 = w1_hwio.shape[-1]
    C2 = w2_io.shape[-1]
    f32, bf16 = jnp.float32, jnp.bfloat16

    Cin_p = _round_up(Cin, LANE)
    C1p = _round_up(C1, LANE)
    C2p = _round_up(C2, LANE)
    Wp2 = _round_up(W + 2, SUBLANE)      # regular sublane tiling of the input
    M = H * W

    w1f, bias = _fold_bn(w1_hwio, gamma, beta, run_mean, run_var, eps)
    w1f = jnp.pad(w1f, ((0, 0), (0, 0), (0, Cin_p - Cin), (0, C1p - C1)))
    w1_mat = w1f.reshape(9 * Cin_p, C1p).astype(bf16)
    bias_p = jnp.pad(bias, (0, C1p - C1)).reshape(1, C1p)
    w2_mat = jnp.pad(w2_io.astype(f32),
                     ((0, C1p - C1), (0, C2p - C2))).astype(bf16)

    # NCHW -> NHWC, 1-px halo + sublane pad on W, channel pad to 128, bf16.
    x_nhwc = jnp.transpose(x_nchw, (0, 2, 3, 1))
    x_pad = jnp.pad(x_nhwc, ((0, 0), (1, 1), (1, Wp2 - W - 1),
                             (0, Cin_p - Cin))).astype(bf16)

    kernel = functools.partial(_im2col_head_kernel, H=H, W=W, Cin_p=Cin_p)

    flops = 2 * B * H * W * (9 * Cin * C1 + C1 * C2)
    bytes_accessed = int(x_pad.size * 2 + w1_mat.size * 2 + w2_mat.size * 2
                         + bias_p.size * 4 + B * M * C2p * 2)
    blk = 2 * ((H + 2) * Wp2 * Cin_p * 2 + M * C2p * 2)
    col_scr = M * 9 * Cin_p * 2
    wts = 2 * (9 * Cin_p * C1p * 2 + C1p * C2p * 2 + C1p * 4)
    wrk = 2 * ((H + 2) * Wp2 * Cin_p * 2
               + M * (Cin_p * 2 + C1p * 4 + C1p * 2 + C2p * 4))
    vmem_limit = int(min(max(blk + col_scr + wts + wrk, 8 * 1024 * 1024),
                         _vmem_budget_bytes()))

    def call(single_buffer_weights):
        return pl.pallas_call(
            kernel,
            out_shape=jax.ShapeDtypeStruct((B, M, C2p), bf16),
            grid_spec=pltpu.PrefetchScalarGridSpec(
                num_scalar_prefetch=0,
                grid=(B,),
                in_specs=[
                    pl.BlockSpec((1, H + 2, Wp2, Cin_p),
                                 lambda b: (b, 0, 0, 0)),
                    _weight_spec((9 * Cin_p, C1p), lambda b: (0, 0),
                                 single_buffer_weights),
                    _weight_spec((1, C1p), lambda b: (0, 0),
                                 single_buffer_weights),
                    _weight_spec((C1p, C2p), lambda b: (0, 0),
                                 single_buffer_weights),
                ],
                out_specs=pl.BlockSpec((1, M, C2p), lambda b: (b, 0, 0)),
                scratch_shapes=[pltpu.VMEM((M, 9 * Cin_p), bf16)],
            ),
            compiler_params=pltpu.CompilerParams(
                dimension_semantics=("parallel",),
                vmem_limit_bytes=vmem_limit),
            cost_estimate=pl.CostEstimate(
                flops=int(flops), transcendentals=0,
                bytes_accessed=bytes_accessed),
        )(x_pad, w1_mat, bias_p, w2_mat)

    try:
        out = call(single_buffer_weights=True)
    except Exception:
        out = call(single_buffer_weights=False)

    out = out[:, :, :C2].astype(f32).reshape(B, H, W, 3, num_classes + 5)
    return jnp.transpose(out, (0, 3, 1, 2, 4))


def scale_prediction_pallas(x_nchw, w1_hwio, gamma, beta, run_mean, run_var,
                            w2_io, num_classes, eps=1e-5):
    Cin = x_nchw.shape[1]
    if Cin < LANE:
        return _small_cin_forward(x_nchw, w1_hwio, gamma, beta, run_mean,
                                  run_var, w2_io, num_classes, eps)
    return _large_cin_forward(x_nchw, w1_hwio, gamma, beta, run_mean,
                              run_var, w2_io, num_classes, eps)


def _reference(x_nchw, w1_hwio, gamma, beta, run_mean, run_var, w2_io,
               num_classes, eps=1e-5):
    """Pure-JAX f32 reference mirroring the PyTorch forward (NCHW convs)."""
    B, Cin, H, W = x_nchw.shape
    C1 = w1_hwio.shape[-1]
    w1_oihw = jnp.transpose(w1_hwio, (3, 2, 0, 1))
    y = lax.conv_general_dilated(
        x_nchw, w1_oihw, window_strides=(1, 1), padding=((1, 1), (1, 1)),
        dimension_numbers=("NCHW", "OIHW", "NCHW"))
    inv = gamma / jnp.sqrt(run_var + eps)
    y = (y - run_mean[None, :, None, None]) * inv[None, :, None, None] \
        + beta[None, :, None, None]
    y = jnp.where(y > 0, y, 0.1 * y)
    w2_oihw = jnp.transpose(w2_io, (1, 0)).reshape(w2_io.shape[1], C1, 1, 1)
    z = lax.conv_general_dilated(
        y, w2_oihw, window_strides=(1, 1), padding="VALID",
        dimension_numbers=("NCHW", "OIHW", "NCHW"))
    out = z.reshape(B, 3, num_classes + 5, H, W)
    return jnp.transpose(out, (0, 1, 3, 4, 2))


if __name__ == "__main__":
    key = jax.random.PRNGKey(0)

    # --- Primary test: the module's small shape (small-Cin / GEMM path). ---
    B, Cin, H, W = 2, 4, 16, 16
    num_classes = 3
    C1 = 2 * Cin
    C2 = 3 * (num_classes + 5)

    k = jax.random.split(key, 7)
    x = jax.random.normal(k[0], (B, Cin, H, W), jnp.float32)
    w1 = jax.random.normal(k[1], (3, 3, Cin, C1), jnp.float32) * 0.1   # HWIO
    w2 = jax.random.normal(k[2], (C1, C2), jnp.float32) * 0.1          # (in, out)
    gamma = jax.random.uniform(k[3], (C1,), jnp.float32, 0.5, 1.5)
    beta = jax.random.normal(k[4], (C1,), jnp.float32) * 0.1
    run_mean = jax.random.normal(k[5], (C1,), jnp.float32) * 0.1
    run_var = jax.random.uniform(k[6], (C1,), jnp.float32, 0.5, 1.5)

    out = scale_prediction_pallas(x, w1, gamma, beta, run_mean, run_var, w2,
                                  num_classes)
    out = jax.block_until_ready(out)

    ref = _reference(x, w1, gamma, beta, run_mean, run_var, w2, num_classes)
    assert out.shape == (B, 3, H, W, num_classes + 5), out.shape
    max_err = float(jnp.max(jnp.abs(out - ref)))
    # bf16 MXU operands / bf16 output vs a pure-f32 reference -> loose tol.
    assert jnp.allclose(out, ref, rtol=5e-2, atol=5e-2), max_err

    # --- Secondary check: large-Cin path (in-kernel im2col into VMEM scratch). ---
    B2, Cin2, H2, W2, nc2 = 1, 128, 8, 8, 3
    C1b, C2b = 2 * Cin2, 3 * (nc2 + 5)
    k2 = jax.random.split(key, 14)
    x2 = jax.random.normal(k2[7], (B2, Cin2, H2, W2), jnp.float32)
    w1b = jax.random.normal(k2[8], (3, 3, Cin2, C1b), jnp.float32) * 0.1
    w2b = jax.random.normal(k2[9], (C1b, C2b), jnp.float32) * 0.1
    gamma2 = jax.random.uniform(k2[10], (C1b,), jnp.float32, 0.5, 1.5)
    beta2 = jax.random.normal(k2[11], (C1b,), jnp.float32) * 0.1
    mean2 = jax.random.normal(k2[12], (C1b,), jnp.float32) * 0.1
    var2 = jax.random.uniform(k2[13], (C1b,), jnp.float32, 0.5, 1.5)

    out2 = scale_prediction_pallas(x2, w1b, gamma2, beta2, mean2, var2, w2b, nc2)
    out2 = jax.block_until_ready(out2)
    ref2 = _reference(x2, w1b, gamma2, beta2, mean2, var2, w2b, nc2)
    assert out2.shape == (B2, 3, H2, W2, nc2 + 5), out2.shape
    # bf16 operands over K=9*128 / 256 vs f32 reference: check max error
    # against the output scale rather than an absolute tolerance.
    err2 = float(jnp.max(jnp.abs(out2 - ref2)))
    scale2 = float(jnp.max(jnp.abs(ref2))) + 1e-6
    assert err2 <= 5e-2 * scale2, (err2, scale2)

    print("KERNEL_OK")
</pallas_src>

<mosaic_0001>
module attributes {stable_mosaic.version = 11 : i64} {
  func.func @_gemm_head_kernel(%arg0: i32, %arg1: i32, %arg2: memref<1x128x128xbf16, #tpu.memory_space<vmem>>, %arg3: memref<128x128xbf16, #tpu.memory_space<vmem>>, %arg4: memref<1x128xf32, #tpu.memory_space<vmem>>, %arg5: memref<128x128xbf16, #tpu.memory_space<vmem>>, %arg6: memref<1x128x128xbf16, #tpu.memory_space<vmem>>) attributes {dimension_semantics = [#tpu.dimension_semantics<parallel>, #tpu.dimension_semantics<parallel>], iteration_bounds = array<i64: 2, 2>, scalar_prefetch = 0 : i64, scratch_operands = 0 : i64, tpu.core_type = #tpu.core_type<tc>, window_params = [{transform_indices = @transform_0, window_bounds = array<i64: 1, 128, 128>}, {pipeline_mode = #tpu.pipeline_mode<synchronous>, transform_indices = @transform_1, window_bounds = array<i64: 128, 128>}, {pipeline_mode = #tpu.pipeline_mode<synchronous>, transform_indices = @transform_2, window_bounds = array<i64: 1, 128>}, {pipeline_mode = #tpu.pipeline_mode<synchronous>, transform_indices = @transform_3, window_bounds = array<i64: 128, 128>}, {transform_indices = @transform_4, window_bounds = array<i64: 1, 128, 128>}]} {
    %c0 = arith.constant 0 : index
    %c0_0 = arith.constant 0 : index
    %c0_1 = arith.constant 0 : index
    %0 = vector.load %arg2[%c0, %c0_0, %c0_1] : memref<1x128x128xbf16, #tpu.memory_space<vmem>>, vector<1x128x128xbf16>
    %1 = vector.shape_cast %0 : vector<1x128x128xbf16> to vector<128x128xbf16>
    %c0_2 = arith.constant 0 : index
    %c0_3 = arith.constant 0 : index
    %2 = vector.load %arg3[%c0_2, %c0_3] : memref<128x128xbf16, #tpu.memory_space<vmem>>, vector<128x128xbf16>
    %c0_4 = arith.constant 0 : index
    %c0_5 = arith.constant 0 : index
    %3 = vector.load %arg4[%c0_4, %c0_5] : memref<1x128xf32, #tpu.memory_space<vmem>>, vector<1x128xf32>
    %c0_6 = arith.constant 0 : index
    %c0_7 = arith.constant 0 : index
    %4 = vector.load %arg5[%c0_6, %c0_7] : memref<128x128xbf16, #tpu.memory_space<vmem>>, vector<128x128xbf16>
    %cst = arith.constant dense<0.000000e+00> : vector<128x128xf32>
    %5 = tpu.matmul %1, %2, %cst {dimension_numbers = #tpu.dot_dimension_numbers<[1], [0], [0], [1], [0, 0, 1, 1], [], []>} : vector<128x128xbf16>, vector<128x128xbf16>, vector<128x128xf32> -> vector<128x128xf32>
    %6 = vector.broadcast %3 : vector<1x128xf32> to vector<128x128xf32>
    %7 = arith.addf %5, %6 : vector<128x128xf32>
    %cst_8 = arith.constant 1.000000e-01 : f32
    %8 = vector.broadcast %cst_8 : f32 to vector<128x128xf32>
    %9 = arith.mulf %8, %7 : vector<128x128xf32>
    %10 = arith.maximumf %7, %9 : vector<128x128xf32>
    %11 = arith.truncf %10 : vector<128x128xf32> to vector<128x128xbf16>
    %cst_9 = arith.constant dense<0.000000e+00> : vector<128x128xf32>
    %12 = tpu.matmul %11, %4, %cst_9 {dimension_numbers = #tpu.dot_dimension_numbers<[1], [0], [0], [1], [0, 0, 1, 1], [], []>} : vector<128x128xbf16>, vector<128x128xbf16>, vector<128x128xf32> -> vector<128x128xf32>
    %13 = arith.truncf %12 : vector<128x128xf32> to vector<128x128xbf16>
    %c0_10 = arith.constant 0 : index
    %c0_11 = arith.constant 0 : index
    %c0_12 = arith.constant 0 : index
    %14 = vector.load %arg6[%c0_10, %c0_11, %c0_12] : memref<1x128x128xbf16, #tpu.memory_space<vmem>>, vector<1x128x128xbf16>
    %15 = vector.shape_cast %14 : vector<1x128x128xbf16> to vector<128x128xbf16>
    %16 = vector.shape_cast %13 : vector<128x128xbf16> to vector<1x128x128xbf16>
    tpu.vector_store %arg6[%c0_10, %c0_11, %c0_12], %16 {strides = array<i32>} : memref<1x128x128xbf16, #tpu.memory_space<vmem>>, vector<1x128x128xbf16>,
    return
  }
  func.func @transform_0(%arg0: i32, %arg1: i32) -> (i32, i32, i32) {
    %c0_i32 = arith.constant 0 : i32
    %c0_i32_0 = arith.constant 0 : i32
    return %arg0, %arg1, %c0_i32 : i32, i32, i32
  }
  func.func @transform_1(%arg0: i32, %arg1: i32) -> (i32, i32) {
    %c0_i32 = arith.constant 0 : i32
    %c0_i32_0 = arith.constant 0 : i32
    %c0_i32_1 = arith.constant 0 : i32
    return %c0_i32, %c0_i32_0 : i32, i32
  }
  func.func @transform_2(%arg0: i32, %arg1: i32) -> (i32, i32) {
    %c0_i32 = arith.constant 0 : i32
    %c0_i32_0 = arith.constant 0 : i32
    %c0_i32_1 = arith.constant 0 : i32
    return %c0_i32, %c0_i32_0 : i32, i32
  }
  func.func @transform_3(%arg0: i32, %arg1: i32) -> (i32, i32) {
    %c0_i32 = arith.constant 0 : i32
    %c0_i32_0 = arith.constant 0 : i32
    %c0_i32_1 = arith.constant 0 : i32
    return %c0_i32, %c0_i32_0 : i32, i32
  }
  func.func @transform_4(%arg0: i32, %arg1: i32) -> (i32, i32, i32) {
    %c0_i32 = arith.constant 0 : i32
    %c0_i32_0 = arith.constant 0 : i32
    return %arg0, %arg1, %c0_i32 : i32, i32, i32
  }
}

module attributes {stable_mosaic.version = 11 : i64} {
  func.func @_gemm_head_kernel(%arg0: i32, %arg1: i32, %arg2: memref<1x128x128xbf16, #tpu.memory_space<vmem>>, %arg3: memref<128x128xbf16, #tpu.memory_space<vmem>>, %arg4: memref<1x128xf32, #tpu.memory_space<vmem>>, %arg5: memref<128x128xbf16, #tpu.memory_space<vmem>>, %arg6: memref<1x128x128xbf16, #tpu.memory_space<vmem>>) attributes {dimension_semantics = [#tpu.dimension_semantics<parallel>, #tpu.dimension_semantics<parallel>], iteration_bounds = array<i64: 2, 2>, scalar_prefetch = 0 : i64, scratch_operands = 0 : i64, tpu.core_type = #tpu.core_type<tc>, window_params = [{transform_indices = @transform_0, window_bounds = array<i64: 1, 128, 128>}, {pipeline_mode = #tpu.pipeline_mode<synchronous>, transform_indices = @transform_1, window_bounds = array<i64: 128, 128>}, {pipeline_mode = #tpu.pipeline_mode<synchronous>, transform_indices = @transform_2, window_bounds = array<i64: 1, 128>}, {pipeline_mode = #tpu.pipeline_mode<synchronous>, transform_indices = @transform_3, window_bounds = array<i64: 128, 128>}, {transform_indices = @transform_4, window_bounds = array<i64: 1, 128, 128>}]} {
    %c0 = arith.constant 0 : index
    %c0_0 = arith.constant 0 : index
    %c0_1 = arith.constant 0 : index
    %0 = vector.load %arg2[%c0, %c0_0, %c0_1] : memref<1x128x128xbf16, #tpu.memory_space<vmem>>, vector<1x128x128xbf16>
    %1 = vector.shape_cast %0 : vector<1x128x128xbf16> to vector<128x128xbf16>
    %c0_2 = arith.constant 0 : index
    %c0_3 = arith.constant 0 : index
    %2 = vector.load %arg3[%c0_2, %c0_3] : memref<128x128xbf16, #tpu.memory_space<vmem>>, vector<128x128xbf16>
    %c0_4 = arith.constant 0 : index
    %c0_5 = arith.constant 0 : index
    %3 = vector.load %arg4[%c0_4, %c0_5] : memref<1x128xf32, #tpu.memory_space<vmem>>, vector<1x128xf32>
    %c0_6 = arith.constant 0 : index
    %c0_7 = arith.constant 0 : index
    %4 = vector.load %arg5[%c0_6, %c0_7] : memref<128x128xbf16, #tpu.memory_space<vmem>>, vector<128x128xbf16>
    %cst = arith.constant dense<0.000000e+00> : vector<128x128xf32>
    %5 = tpu.matmul %1, %2, %cst {dimension_numbers = #tpu.dot_dimension_numbers<[1], [0], [0], [1], [0, 0, 1, 1], [], []>} : vector<128x128xbf16>, vector<128x128xbf16>, vector<128x128xf32> -> vector<128x128xf32>
    %6 = vector.broadcast %3 : vector<1x128xf32> to vector<128x128xf32>
    %7 = arith.addf %5, %6 : vector<128x128xf32>
    %cst_8 = arith.constant 1.000000e-01 : f32
    %8 = vector.broadcast %cst_8 : f32 to vector<128x128xf32>
    %9 = arith.mulf %8, %7 : vector<128x128xf32>
    %10 = arith.maximumf %7, %9 : vector<128x128xf32>
    %11 = arith.truncf %10 : vector<128x128xf32> to vector<128x128xbf16>
    %cst_9 = arith.constant dense<0.000000e+00> : vector<128x128xf32>
    %12 = tpu.matmul %11, %4, %cst_9 {dimension_numbers = #tpu.dot_dimension_numbers<[1], [0], [0], [1], [0, 0, 1, 1], [], []>} : vector<128x128xbf16>, vector<128x128xbf16>, vector<128x128xf32> -> vector<128x128xf32>
    %13 = arith.truncf %12 : vector<128x128xf32> to vector<128x128xbf16>
    %c0_10 = arith.constant 0 : index
    %c0_11 = arith.constant 0 : index
    %c0_12 = arith.constant 0 : index
    %14 = vector.load %arg6[%c0_10, %c0_11, %c0_12] : memref<1x128x128xbf16, #tpu.memory_space<vmem>>, vector<1x128x128xbf16>
    %15 = vector.shape_cast %14 : vector<1x128x128xbf16> to vector<128x128xbf16>
    %16 = vector.shape_cast %13 : vector<128x128xbf16> to vector<1x128x128xbf16>
    tpu.vector_store %arg6[%c0_10, %c0_11, %c0_12], %16 {strides = array<i32>} : memref<1x128x128xbf16, #tpu.memory_space<vmem>>, vector<1x128x128xbf16>,
    return
  }
  func.func @transform_0(%arg0: i32, %arg1: i32) -> (i32, i32, i32) {
    %c0_i32 = arith.constant 0 : i32
    %c0_i32_0 = arith.constant 0 : i32
    return %arg0, %arg1, %c0_i32 : i32, i32, i32
  }
  func.func @transform_1(%arg0: i32, %arg1: i32) -> (i32, i32) {
    %c0_i32 = arith.constant 0 : i32
    %c0_i32_0 = arith.constant 0 : i32
    %c0_i32_1 = arith.constant 0 : i32
    return %c0_i32, %c0_i32_0 : i32, i32
  }
  func.func @transform_2(%arg0: i32, %arg1: i32) -> (i32, i32) {
    %c0_i32 = arith.constant 0 : i32
    %c0_i32_0 = arith.constant 0 : i32
    %c0_i32_1 = arith.constant 0 : i32
    return %c0_i32, %c0_i32_0 : i32, i32
  }
  func.func @transform_3(%arg0: i32, %arg1: i32) -> (i32, i32) {
    %c0_i32 = arith.constant 0 : i32
    %c0_i32_0 = arith.constant 0 : i32
    %c0_i32_1 = arith.constant 0 : i32
    return %c0_i32, %c0_i32_0 : i32, i32
  }
  func.func @transform_4(%arg0: i32, %arg1: i32) -> (i32, i32, i32) {
    %c0_i32 = arith.constant 0 : i32
    %c0_i32_0 = arith.constant 0 : i32
    return %arg0, %arg1, %c0_i32 : i32, i32, i32
  }
}

</mosaic_0001>

<bundles_post_ra>
// kernel: tpu_custom_call.1
= control target key start
LH: loop header
LB: loop body
LE: loop exit
PB: predicated region body
PF: predicated region fallthrough
CT: control target
= control target key end

     0   :  { %s1806_s0 = inlined_call_operand.hbm [shape: bf16[2,256,128], index: 0, kind: input, shape index: {}]   ;;  %s1807_s1 = inlined_call_operand.hbm [shape: bf16[128,128], index: 1, kind: input, shape index: {}]   ;;  %s1808_s2 = inlined_call_operand.vmem [shape: f32[1,128], index: 2, kind: input, shape index: {}]   ;;  %s1809_s3 = inlined_call_operand.hbm [shape: bf16[128,128], index: 3, kind: input, shape index: {}]   ;;  %s1810_s4 = inlined_call_operand.hbm [shape: bf16[2,256,128], index: 4, kind: output, shape index: {}]  }
   0x1   :  { %1821 = sst [smem:[#allocation15_spill]] %s1807_s1 }
   0x2   :  { %1822 = sst [smem:[#allocation16_spill]] %s1809_s3 }
   0x3   :  { %1823 = sst [smem:[#allocation17_spill]] %s1810_s4 }
   0x4   :  { %9 = vsyncpa [#allocation3], 0 }
   0x5   :  { %11 = vsyncpa [#allocation3 + $0x1], 0 }
   0x6   :  { %12 = vsyncpa [#allocation6], 0 }
   0x7   :  { %13 = vsyncpa [#allocation4], 0 }
   0x8   :  { %15 = vsyncpa [#allocation4 + $0x1], 0  ;;  %s1475_s15 = smov 0   ;;  %s1477_s16 = smov 0  }
   0x9   :  { %s1479_s17 = smov 0   ;;  %s1481_s18 = smov 0  }
   0xa   :  { %s1483_s19 = smov 0   ;;  %s1485_s20 = smov 0  }
   0xb   :  { %s1487_s21 = smov 0   ;;  %s1489_s22 = smov 0  }
   0xc LB: > { %1824 = sst [smem:[#allocation12_spill]] %s1412_s15  ;;  %s904_s23 = sadd.s32 4294967295, %s1440_s22   ;;  %s1440_s22 = sphi %s1489_s22, %s21_s22   ;;  %s1436_s21 = sphi %s1487_s21, %s1855_s21   ;;  %s1432_s20 = sphi %s1485_s20, %s1854_s20   ;;  %s1428_s19 = sphi %s1483_s19, %s1853_s19   ;;  %s1424_s18 = sphi %s1481_s18, %s1852_s18   ;;  %s1420_s17 = sphi %s1479_s17, %s1851_s17   ;;  %s1416_s16 = sphi %s1477_s16, %s1850_s16   ;;  %s1412_s15 = sphi %s1475_s15, %s1849_s15  }
   0xd   : > { %s905_s24 = sadd.s32 4294967294, %s1440_s22   ;;  %p55_p0 = scmp.ne.s32.totalorder %s1416_s16, %s1412_s15 }
   0xe   : > { %p1519_p1 = scmp.eq.s32.totalorder %s904_s23, 0  ;;  %p1523_p2 = scmp.eq.s32.totalorder %s904_s23, 3 }
   0xf   : > { %p150_p3 = scmp.eq.s32.totalorder %s905_s24, 3  ;;  %p906_p5 = scmp.ge.s32.totalorder %s1440_s22, 1 }
  0x10   : > { %s1825_s25 = scalar_select %p1519_p1, 1, 0 }
  0x11   : > { %s1826_s26 = scalar_select %p1523_p2, 1, 0 }
  0x12   : > { %p1529_p4 = por %p1519_p1, %p55_p0  ;;  %p1534_p6 = por %p150_p3, %p55_p0 }
  0x13   : > { %p157_p7 = scmp.lt.s32.totalorder %s1440_s22, 5  ;;  %s1442_s30 = smov [#allocation5]  }
  0x14   : > { %s1827_s27 = scalar_select %p1529_p4, 1, 0 }
  0x15   : > { %s1828_s28 = scalar_select %p1534_p6, 1, 0 }
  0x16   : > { %p1539_p8 = pnand %p906_p5, %p157_p7  ;;  %s169_s5 = sshll.u32 %s1442_s30, 4  ;;  %s170_s5 = int_to_ptr.vmem [resolvable:$true] %s169_s5 }
  0x17   : > { %1829 = sst [smem:[#allocation13_spill]] %s1828_s28  ;;  %s1443_s7 = smov [#allocation7]  }
  0x18   : > { %s1830_s29 = scalar_select %p1539_p8, 1, 0 }
  0x19   : > { %p1137_p9 = pneg %p1539_p8  ;;  %s185_s8 = sshll.u32 %s1443_s7, 4  ;;  %s1551_s8 = int_to_ptr.vmem [resolvable:$true] %s185_s8 }
  0x1a   : > { %s1832_s1 = sld [smem:[#allocation15_spill]] }
  0x1b   : > { %p1547_p10 = pnand %p1137_p9, %p1519_p1 }
  0x1d   : > { %p1254_p12 = pneg %p1547_p10 }
  0x20   : > { %s1252_s11 = scalar_lea.hbm %s1832_s1, 1024 }
  0x21   : > { %p1253_p11 = scmp.ne.s32.totalorder %s1832_s1, %s1252_s11  ;;  %p1259_p3 = scmp.lt.u32.totalorder %s1252_s11, %s1832_s1 }
  0x23   : > { %p1255_p13 = pnand %p1254_p12, %p1253_p11 }
  0x25   : > { %p1256_p0 = pneg %p1255_p13 }
  0x27   : > { %p1261_p5 = pnand %p1259_p3, %p1256_p0 }
  0x29   : > { %1264 = shalt.err (!%p1261_p5)
}
  0x2a   : > { %s1265_s24 = scalar_lea.vmem %s170_s5, 1024  ;;  %p1273_p1 = scmp.lt.s32.totalorder %s170_s5, %s170_s5 }
  0x2b   : > { %p1266_p7 = scmp.ne.s32.totalorder %s170_s5, %s1265_s24  ;;  %p1274_p4 = scmp.lt.s32.totalorder %s1265_s24, %s1265_s24 }
  0x2d   : > { %p1268_p9 = pnand %p1266_p7, %p1254_p12  ;;  %p1275_p8 = por %p1274_p4, %p1273_p1 }
  0x2f   : > { %p1269_p6 = pneg %p1268_p9 }
  0x31   : > { %p1276_p2 = pnand %p1275_p8, %p1269_p6 }
  0x33   : > { %1279 = shalt.err (!%p1276_p2)
}
  0x34   : > { %s1816_s30 = smov 64   ;;  %s1817_s7 = smov 4  }
  0x35   : > { %1140 = dma.hbm_to_vmem [thread:$0]  (!%p1547_p10), %s1832_s1, 1024, %s170_s5, [#allocation6], %s1816_s30, %s1816_s30, %s1817_s7  }
  0x36   : > { %s1833_s3 = sld [smem:[#allocation16_spill]] }
  0x3c   : > { %s1280_s13 = scalar_lea.hbm %s1833_s3, 1024 }
  0x3d   : > { %p1281_p1 = scmp.ne.s32.totalorder %s1833_s3, %s1280_s13  ;;  %p1287_p6 = scmp.lt.u32.totalorder %s1280_s13, %s1833_s3 }
  0x3f   : > { %p1283_p2 = pnand %p1281_p1, %p1254_p12 }
  0x41   : > { %p1284_p4 = pneg %p1283_p2 }
  0x43   : > { %p1289_p8 = pnand %p1287_p6, %p1284_p4 }
  0x45   : > { %1292 = shalt.err (!%p1289_p8)
}
  0x46   : > { %s1293_s5 = scalar_lea.vmem %s1551_s8, 1024  ;;  %p1301_p3 = scmp.lt.s32.totalorder %s1551_s8, %s1551_s8 }
  0x47   : > { %p1294_p11 = scmp.ne.s32.totalorder %s1551_s8, %s1293_s5  ;;  %p1302_p5 = scmp.lt.s32.totalorder %s1293_s5, %s1293_s5 }
  0x49   : > { %p1296_p13 = pnand %p1294_p11, %p1254_p12  ;;  %p1303_p7 = por %p1302_p5, %p1301_p3 }
  0x4b   : > { %p1297_p0 = pneg %p1296_p13 }
  0x4d   : > { %p1304_p9 = pnand %p1303_p7, %p1297_p0 }
  0x4f   : > { %1307 = shalt.err (!%p1304_p9)
}
  0x50   : > { %1143 = dma.hbm_to_vmem [thread:$0]  (!%p1547_p10), %s1833_s3, 1024, %s1551_s8, [#allocation6], %s1816_s30, %s1816_s30, %s1817_s7  }
  0x51   : > { %s30_s6 = sadd.s32 1, %s1432_s20  ;;  %s33_s10 = sadd.s32 1, %s1436_s21 }
  0x52   : > { %p31_p12 = scmp.ge.s32.totalorder %s30_s6, 2  ;;  %s42_s11 = sadd.s32 1, %s1420_s17 }
  0x53   : > { %p49_p1 = scmp.ne.s32.totalorder %s1420_s17, %s1416_s16  ;;  %p50_p2 = scmp.eq.s32.totalorder %s1440_s22, 0 }
  0x54   : > { %s1857_s6 = smov (%p31_p12, %s30_s6), 0  ;;  %s1859_s10 = smov (!%p31_p12, %s33_s10), %s1436_s21 }
  0x55   : > { %1834 = sst [smem:[#allocation14_spill]] %s1857_s6  ;;  %s38_s12 = ssub.s32 %s1432_s20, %s1857_s6 }
  0x56   : > { %p1617_p4 = por %p50_p2, %p49_p1  ;;  %p35_p10 = scmp.ge.s32.totalorder %s1859_s10, 2 }
  0x57   : > { %p1836_p6 = scmp.ne.s32.totalorder %s1826_s26, 0  ;;  %p1154_p11 = scmp.lt.s32.totalorder %s1440_s22, 4 }
  0x58   : > { %s199_s14 = sand.u32 1, %s1420_s17   ;;  %s1861_s10 = smov (%p35_p10, %s1859_s10), 0 }
  0x59   : > { %p1623_p8 = por %p1836_p6, %p49_p1  ;;  %s910_s23 = sshll.u32 %s199_s14, 6 }
  0x5a   : > { %s37_s24 = ssub.s32 %s1436_s21, %s1861_s10  ;;  %s911_s28 = sshll.u32 %s1432_s20, 4 }
  0x5b   : > { %s39_s5 = sor.u32 %s38_s12, %s37_s24  ;;  %s912_s9 = sshll.u32 %s1436_s21, 5 }
  0x5c   : > { %p40_p13 = scmp.eq.s32.totalorder %s39_s5, 0  ;;  %s209_s30 = sadd.s32 %s912_s9, %s911_s28 }
  0x5d   : > { %s203_s7 = scalar_lea.vmem [#allocation2], %s910_s23  ;;  %s913_s3 = sshll.u32 %s209_s30, 6 }
  0x5e   : > { %s212_s26 = sshll.u32 %s203_s7, 4  ;;  %s1643_s4 = scalar_lea.hbm %s1806_s0, %s913_s3  ;;  %s1638_s26 = int_to_ptr.vmem [resolvable:$true] %s212_s26 }
  0x5f   : > { %s1636_s1 = scalar_select %p40_p13, %s1420_s17, %s42_s11  }
  0x60   : > { %p1649_p0 = pnand %p1154_p11, %p1617_p4  ;;  %s1653_s30 = scalar_lea.sflag [#allocation3], %s199_s14 }
  0x61   : > { %s1308_s7 = scalar_lea.hbm %s1643_s4, 1024  ;;  %s1313_s6 = scalar_lea.hbm %s1806_s0, 4096 }
  0x62   : > { %p1309_p3 = scmp.ne.s32.totalorder %s1643_s4, %s1308_s7  ;;  %p1310_p5 = pneg %p1649_p0 }
  0x63   : > { %p1314_p12 = scmp.lt.u32.totalorder %s1643_s4, %s1806_s0  ;;  %p1315_p1 = scmp.lt.u32.totalorder %s1313_s6, %s1308_s7 }
  0x64   : > { %p1311_p7 = pnand %p1310_p5, %p1309_p3  ;;  %p1317_p4 = scmp.lt.u32.totalorder %s1308_s7, %s1643_s4 }
  0x65   : > { %p1316_p2 = por %p1315_p1, %p1314_p12 }
  0x66   : > { %p1312_p9 = pneg %p1311_p7 }
  0x67   : > { %p1318_p10 = por %p1317_p4, %p1316_p2 }
  0x69   : > { %p1319_p6 = pnand %p1318_p10, %p1312_p9 }
  0x6b   : > { %1322 = shalt.err (!%p1319_p6)
}
  0x6c   : > { %s1323_s14 = scalar_lea.vmem %s1638_s26, 1024  ;;  %s1446_s23 = smov [#allocation2]  }
  0x6d   : > { %p1324_p11 = scmp.ne.s32.totalorder %s1638_s26, %s1323_s14  ;;  %s1328_s24 = sshll.u32 %s1446_s23, 4  ;;  %s1329_s24 = int_to_ptr.vmem [resolvable:$false] %s1328_s24 }
  0x6e   : > { %s1330_s5 = scalar_lea.vmem %s1329_s24, 2048  ;;  %p1331_p7 = scmp.lt.s32.totalorder %s1638_s26, %s1329_s24 }
  0x6f   : > { %p1326_p13 = pnand %p1324_p11, %p1310_p5  ;;  %p1332_p12 = scmp.lt.s32.totalorder %s1330_s5, %s1323_s14 }
  0x71   : > { %p1327_p3 = pneg %p1326_p13  ;;  %p1333_p1 = por %p1332_p12, %p1331_p7 }
  0x73   : > { %p1334_p2 = pnand %p1333_p1, %p1327_p3 }
  0x75   : > { %1337 = shalt.err (!%p1334_p2)
}
  0x76   : > { %s1839_s28 = smov 4   ;;  %s1840_s9 = smov 64  }
  0x77   : > { %1147 = dma.hbm_to_vmem [thread:$0]  (!%p1649_p0), %s1643_s4, 1024, %s1638_s26, %s1653_s30, %s1840_s9, %s1840_s9, %s1839_s28  }
  0x78   : > { %p1841_p5 = scmp.ne.s32.totalorder %s1830_s29, 0 }
  0x79   : > { %s1687_s7 = sand.u32 (!%p1841_p5), 1, %s1416_s16   ;;  %p1842_p9 = scmp.ne.s32.totalorder (!%p1841_p5), %s1827_s27, 0 }
  0x7a   : > { %224 = sbr.rel (%p1841_p5) target bundleno = 646 (0x286), region = 36  ;;  %s915_s3 = sshll.u32 (!%p1841_p5), %s1687_s7, 6 }
  0x7b   : > { %s227_s15 = scalar_lea.sflag (!%p1841_p5), [#allocation3], %s1687_s7  ;;  %s1693_s12 = scalar_lea.vmem (!%p1841_p5), [#allocation2], %s915_s3 }
  0x81   : > { %1399 = dma.done.wait (%p1842_p9), %s227_s15, 1024  }
  0x82   : > { %1401 = vsyncadd (%p1842_p9), %s227_s15, 4294966272  ;;  %p1843_p0 = scmp.ne.s32.totalorder %s1825_s25, 0 }
  0x84   : > { %1403 = dma.done.wait (%p1843_p0), [#allocation6], 2048  }
  0x85   : > { %1405 = vsyncadd (%p1843_p0), [#allocation6], 4294965248  ;;  %v1228_v0 = vld [vmem:[#allocation5] sm:$0xff]   ;;  %v1229_v1 = vld [vmem:[#allocation5 + $0x8] sm:$0xff]   ;;  %s1734_s27 = scalar_lea.vmem [#allocation8], %s915_s3  ;;  %s961_s29 = sshll.u32 %s1424_s18, 4 }
  0x86   : > { %1061 = vmatprep.subr.bf16.mxu0 %v1228_v0  ;;  %v1230_v2 = vld [vmem:[#allocation5 + $0x10] sm:$0xff]   ;;  %v1231_v3 = vld [vmem:[#allocation5 + $0x18] sm:$0xff]   ;;  %v1236_v4 = vld [vmem:[%s1693_s12] sm:$0xff]   ;;  %s962_s26 = sshll.u32 %s1428_s19, 5  ;;  %s795_s6 = sshll.u32 %s1734_s27, 4  ;;  %s1745_s6 = int_to_ptr.vmem [resolvable:$true] %s795_s6 }
  0x87   : > { %1062 = vmatpush3.bf16.msra.mxu0 %v1228_v0  ;;  %1077 = vmatprep.mubr.bf16.mxu0 %v1236_v4  ;;  %v1232_v5 = vld [vmem:[#allocation5 + $0x20] sm:$0xff]   ;;  %v1233_v6 = vld [vmem:[#allocation5 + $0x28] sm:$0xff]   ;;  %v1234_v9 = vld [vmem:[#allocation5 + $0x30] sm:$0xff]   ;;  %s792_s30 = sadd.s32 %s962_s26, %s961_s29  ;;  %s1844_s13 = sld [smem:[#allocation17_spill]] }
  0x88   : > { %1063 = vmatprep.subr.bf16.mxu0 %v1229_v1  ;;  %v1244_v7 = vld [vmem:[#allocation7] sm:$0xff]   ;;  %v1245_v8 = vld [vmem:[#allocation7 + $0x8] sm:$0xff]   ;;  %v1246_v10 = vld [vmem:[#allocation7 + $0x10] sm:$0xff]   ;;  %s963_s11 = sshll.u32 %s792_s30, 6  ;;  %s780_s23 = scalar_lea.sflag [#allocation4], %s1687_s7 }
  0x89   : > { %1093 = vmatprep.subr.bf16.mxu1 %v1244_v7  ;;  %v1235_v11 = vld [vmem:[#allocation5 + $0x38] sm:$0xff]   ;;  %v1248_v13 = vld [vmem:[#allocation7 + $0x20] sm:$0xff]   ;;  %v1237_v14 = vld [vmem:[%s1693_s12 + $0x8] sm:$0xff]   ;;  %s1338_s24 = scalar_lea.vmem %s1745_s6, 1024  ;;  %s1447_s5 = smov [#allocation8]  }
  0x8a   : > { %1094 = vmatpush3.bf16.msra.mxu1 %v1244_v7  ;;  %v1247_v12 = vld [vmem:[#allocation7 + $0x18] sm:$0xff]   ;;  %v1238_v15 = vld [vmem:[%s1693_s12 + $0x10] sm:$0xff]   ;;  %v1240_v17 = vld [vmem:[%s1693_s12 + $0x20] sm:$0xff]   ;;  %p1339_p4 = scmp.ne.s32.totalorder %s1745_s6, %s1338_s24  ;;  %s1342_s28 = sshll.u32 %s1447_s5, 4  ;;  %s1343_s28 = int_to_ptr.vmem [resolvable:$false] %s1342_s28 }
  0x8b   : > { %1064 = vmatpush3.bf16.msra.mxu0 %v1229_v1  ;;  %1095 = vmatprep.subr.bf16.mxu1 %v1245_v8  ;;  %v1239_v16 = vld [vmem:[%s1693_s12 + $0x18] sm:$0xff]   ;;  %v1241_v18 = vld [vmem:[%s1693_s12 + $0x28] sm:$0xff]   ;;  %v1242_v19 = vld [vmem:[%s1693_s12 + $0x30] sm:$0xff]   ;;  %s1344_s9 = scalar_lea.vmem %s1343_s28, 2048  ;;  %p1345_p11 = scmp.lt.s32.totalorder %s1745_s6, %s1343_s28 }
  0x8c   : > { %1065 = vmatprep.subr.bf16.mxu0 %v1230_v2  ;;  %v1243_v20 = vld [vmem:[%s1693_s12 + $0x38] sm:$0xff]   ;;  %v1249_v21 = vld [vmem:[#allocation7 + $0x28] sm:$0xff]   ;;  %v1250_v22 = vld [vmem:[#allocation7 + $0x30] sm:$0xff]   ;;  %p1340_p10 = pnand %p1339_p4, %p1623_p8  ;;  %p1346_p13 = scmp.lt.s32.totalorder %s1344_s9, %s1338_s24 }
  0x8d   : > { %v1251_v23 = vld [vmem:[#allocation7 + $0x38] sm:$0xff]   ;;  %v1714_v24 = vld [vmem:[%s1808_s2] ss:$0 sm:$0xff]  ;;  %s1750_s14 = scalar_lea.hbm %s1844_s13, %s963_s11 }
  0x8e   : > { %1096 = vmatpush3.bf16.msra.mxu1 %v1245_v8  ;;  %p1341_p6 = pneg %p1340_p10  ;;  %p1347_p3 = por %p1346_p13, %p1345_p11 }
  0x8f   : > { %1066 = vmatpush3.bf16.msra.mxu0 %v1230_v2  ;;  %1097 = vmatprep.subr.bf16.mxu1 %v1246_v10 }
  0x90   : > { %1067 = vmatprep.subr.bf16.mxu0 %v1231_v3  ;;  %p1348_p7 = pnand %p1347_p3, %p1341_p6 }
  0x92   : > { %1098 = vmatpush3.bf16.msra.mxu1 %v1246_v10 }
  0x93   : > { %1068 = vmatpush3.bf16.msra.mxu0 %v1231_v3  ;;  %1099 = vmatprep.subr.bf16.mxu1 %v1247_v12 }
  0x94   : > { %1069 = vmatprep.subr.bf16.mxu0 %v1232_v5 }
  0x96   : > { %1100 = vmatpush3.bf16.msra.mxu1 %v1247_v12 }
  0x97   : > { %1070 = vmatpush3.bf16.msra.mxu0 %v1232_v5  ;;  %1101 = vmatprep.subr.bf16.mxu1 %v1248_v13 }
  0x98   : > { %1071 = vmatprep.subr.bf16.mxu0 %v1233_v6 }
  0x9a   : > { %1102 = vmatpush3.bf16.msra.mxu1 %v1248_v13 }
  0x9b   : > { %1072 = vmatpush3.bf16.msra.mxu0 %v1233_v6  ;;  %1103 = vmatprep.subr.bf16.mxu1 %v1249_v21 }
  0x9c   : > { %1073 = vmatprep.subr.bf16.mxu0 %v1234_v9 }
  0x9e   : > { %1104 = vmatpush3.bf16.msra.mxu1 %v1249_v21 }
  0x9f   : > { %1074 = vmatpush3.bf16.msra.mxu0 %v1234_v9  ;;  %1105 = vmatprep.subr.bf16.mxu1 %v1250_v22 }
  0xa0   : > { %1075 = vmatprep.subr.bf16.mxu0 %v1235_v11 }
  0xa2   : > { %1106 = vmatpush3.bf16.msra.mxu1 %v1250_v22 }
  0xa3   : > { %1076 = vmatpush3.bf16.msra.mxu0 %v1235_v11  ;;  %1107 = vmatprep.subr.bf16.mxu1 %v1251_v23 }
  0xa6   : > { %1078 = vmatmul.mubr.bf16.vlgmr.msra.gmra.mrb[0].mxu0 %v1237_v14  ;;  %1108 = vmatpush3.bf16.msra.mxu1 %v1251_v23 }
  0xa7   : > { %1081 = vmatprep.mubr.bf16.mxu0 %v1238_v15 }
  0xae   : > { %1082 = vmatmul.mubr.bf16.gmra.mrb[4].mxu0 %v1239_v16 }
  0xaf   : > { %1085 = vmatprep.mubr.bf16.mxu0 %v1240_v17 }
  0xb6   : > { %1086 = vmatmul.mubr.bf16.gmra.mrb[8].mxu0 %v1241_v18 }
  0xb7   : > { %1089 = vmatprep.mubr.bf16.mxu0 %v1242_v19 }
  0xbe   : > { %1090 = vmatmul.mubr.bf16.gmra.mrb[12].mxu0 %v1243_v20 }
 0x179   : > { %v1079_v25 = vpop.f32.mrb[0].mxu0 }
 0x17a   : > { %v460_v26 = vadd.f32 %v1079_v25, %v1714_v24  ;;  %v451_v27 = vpop.f32.mrb[1].mxu0 }
 0x17b   : > { %v452_v28 = vadd.f32 %v1714_v24, %v451_v27  ;;  %v1080_v29 = vpop.f32.mrb[2].mxu0 }
 0x17c   : > { %v516_v30 = vmul.f32 0.1, %v460_v26  ;;  %v463_v31 = vadd.f32 %v1080_v29, %v1714_v24  ;;  %v454_v32 = vpop.f32.mrb[3].mxu0 }
 0x17d   : > { %v514_v33 = vmul.f32 0.1, %v452_v28  ;;  %v455_v34 = vadd.f32 %v1714_v24, %v454_v32 }
 0x17e   : > { %v517_v35 = vmul.f32 0.1, %v463_v31  ;;  %v532_v37 = vmax.f32 %v460_v26, %v516_v30 }
 0x17f   : > { %v515_v36 = vmul.f32 0.1, %v455_v34  ;;  %v530_v40 = vmax.f32 %v452_v28, %v514_v33 }
 0x180   : > { %v533_v38 = vmax.f32 %v463_v31, %v517_v35 }
 0x181   : > { %v1083_v39 = vpop.f32.mrb[4].mxu0  ;;  %v531_v41 = vmax.f32 %v455_v34, %v515_v36 }
 0x182   : > { %v476_v42 = vadd.f32 %v1083_v39, %v1714_v24  ;;  %v467_v43 = vpop.f32.mrb[5].mxu0  ;;  %v547_v44 = vpack.c.bf16 %v533_v38, %v532_v37 }
 0x183   : > { %v468_v45 = vadd.f32 %v1714_v24, %v467_v43  ;;  %v1084_v46 = vpop.f32.mrb[6].mxu0  ;;  %v546_v47 = vpack.c.bf16 %v531_v41, %v530_v40 }
 0x184   : > { %v520_v48 = vmul.f32 0.1, %v476_v42  ;;  %v479_v49 = vadd.f32 %v1084_v46, %v1714_v24  ;;  %v470_v50 = vpop.f32.mrb[7].mxu0 }
 0x185   : > { %v518_v51 = vmul.f32 0.1, %v468_v45  ;;  %v471_v52 = vadd.f32 %v1714_v24, %v470_v50  ;;  %1109 = vmatprep.mubr.bf16.mxu1 %v546_v47 }
 0x186   : > { %v521_v53 = vmul.f32 0.1, %v479_v49  ;;  %1110 = vmatmul.mubr.bf16.vlgmr.msra.gmra.mrb[0].mxu1 %v547_v44  ;;  %v536_v55 = vmax.f32 %v476_v42, %v520_v48 }
 0x187   : > { %v519_v54 = vmul.f32 0.1, %v471_v52  ;;  %v534_v57 = vmax.f32 %v468_v45, %v518_v51 }
 0x188   : > { %v537_v56 = vmax.f32 %v479_v49, %v521_v53 }
 0x189   : > { %v535_v58 = vmax.f32 %v471_v52, %v519_v54  ;;  %v1087_v59 = vpop.f32.mrb[8].mxu0 }
 0x18a   : > { %v492_v60 = vadd.f32 %v1087_v59, %v1714_v24  ;;  %v483_v61 = vpop.f32.mrb[9].mxu0  ;;  %v549_v62 = vpack.c.bf16 %v537_v56, %v536_v55 }
 0x18b   : > { %v484_v63 = vadd.f32 %v1714_v24, %v483_v61  ;;  %v1088_v0 = vpop.f32.mrb[10].mxu0  ;;  %v548_v1 = vpack.c.bf16 %v535_v58, %v534_v57 }
 0x18c   : > { %v524_v2 = vmul.f32 0.1, %v492_v60  ;;  %v495_v3 = vadd.f32 %v1088_v0, %v1714_v24  ;;  %v486_v4 = vpop.f32.mrb[11].mxu0 }
 0x18d   : > { %v522_v5 = vmul.f32 0.1, %v484_v63  ;;  %v487_v6 = vadd.f32 %v1714_v24, %v486_v4  ;;  %1113 = vmatprep.mubr.bf16.mxu1 %v548_v1 }
 0x18e   : > { %v525_v7 = vmul.f32 0.1, %v495_v3  ;;  %1114 = vmatmul.mubr.bf16.gmra.mrb[4].mxu1 %v549_v62  ;;  %v540_v9 = vmax.f32 %v492_v60, %v524_v2 }
 0x18f   : > { %v523_v8 = vmul.f32 0.1, %v487_v6  ;;  %v538_v11 = vmax.f32 %v484_v63, %v522_v5 }
 0x190   : > { %v541_v10 = vmax.f32 %v495_v3, %v525_v7 }
 0x191   : > { %v539_v12 = vmax.f32 %v487_v6, %v523_v8  ;;  %v1091_v13 = vpop.f32.mrb[12].mxu0 }
 0x192   : > { %v508_v14 = vadd.f32 %v1091_v13, %v1714_v24  ;;  %v499_v15 = vpop.f32.mrb[13].mxu0  ;;  %v551_v16 = vpack.c.bf16 %v541_v10, %v540_v9 }
 0x193   : > { %v500_v17 = vadd.f32 %v1714_v24, %v499_v15  ;;  %v1092_v18 = vpop.f32.mrb[14].mxu0  ;;  %v550_v19 = vpack.c.bf16 %v539_v12, %v538_v11 }
 0x194   : > { %v528_v20 = vmul.f32 0.1, %v508_v14  ;;  %v511_v21 = vadd.f32 %v1092_v18, %v1714_v24  ;;  %v502_v22 = vpop.f32.mrb[15].mxu0 }
 0x195   : > { %v526_v23 = vmul.f32 0.1, %v500_v17  ;;  %v503_v25 = vadd.f32 %v1714_v24, %v502_v22  ;;  %1117 = vmatprep.mubr.bf16.mxu1 %v550_v19 }
 0x196   : > { %v529_v26 = vmul.f32 0.1, %v511_v21  ;;  %1118 = vmatmul.mubr.bf16.gmra.mrb[8].mxu1 %v551_v16  ;;  %v544_v28 = vmax.f32 %v508_v14, %v528_v20 }
 0x197   : > { %v527_v27 = vmul.f32 0.1, %v503_v25  ;;  %v542_v30 = vmax.f32 %v500_v17, %v526_v23 }
 0x198   : > { %v545_v29 = vmax.f32 %v511_v21, %v529_v26 }
 0x199   : > { %v543_v31 = vmax.f32 %v503_v25, %v527_v27 }
 0x19a   : > { %v553_v32 = vpack.c.bf16 %v545_v29, %v544_v28 }
 0x19b   : > { %v552_v33 = vpack.c.bf16 %v543_v31, %v542_v30 }
 0x19d   : > { %1121 = vmatprep.mubr.bf16.mxu1 %v552_v33 }
 0x19e   : > { %1122 = vmatmul.mubr.bf16.gmra.mrb[12].mxu1 %v553_v32 }
 0x259   : > { %v1111_v34 = vpop.f32.mrb[0].mxu1 }
 0x25a   : > { %v636_v35 = vpop.f32.mrb[1].mxu1 }
 0x25b   : > { %v1112_v36 = vpop.f32.mrb[2].mxu1 }
 0x25c   : > { %v990_v37 = vpack.c.bf16 %v1112_v36, %v1111_v34  ;;  %v639_v38 = vpop.f32.mrb[3].mxu1 }
 0x25d   : > { %v985_v24 = vpack.c.bf16 %v639_v38, %v636_v35 }
 0x25e   : > { %1022 = vst [vmem:[%s1734_s27 + $0x8] sm:$0xff] %v990_v37  }
 0x25f   : > { %986 = vst [vmem:[%s1734_s27] sm:$0xff] %v985_v24  }
 0x261   : > { %v1115_v39 = vpop.f32.mrb[4].mxu1 }
 0x262   : > { %v652_v40 = vpop.f32.mrb[5].mxu1 }
 0x263   : > { %v1116_v41 = vpop.f32.mrb[6].mxu1 }
 0x264   : > { %v1000_v42 = vpack.c.bf16 %v1116_v41, %v1115_v39  ;;  %v655_v43 = vpop.f32.mrb[7].mxu1 }
 0x265   : > { %v995_v44 = vpack.c.bf16 %v655_v43, %v652_v40 }
 0x266   : > { %1024 = vst [vmem:[%s1734_s27 + $0x18] sm:$0xff] %v1000_v42  }
 0x267   : > { %1023 = vst [vmem:[%s1734_s27 + $0x10] sm:$0xff] %v995_v44  }
 0x269   : > { %v1119_v45 = vpop.f32.mrb[8].mxu1 }
 0x26a   : > { %v668_v46 = vpop.f32.mrb[9].mxu1 }
 0x26b   : > { %v1120_v47 = vpop.f32.mrb[10].mxu1 }
 0x26c   : > { %v1010_v48 = vpack.c.bf16 %v1120_v47, %v1119_v45  ;;  %v671_v49 = vpop.f32.mrb[11].mxu1 }
 0x26d   : > { %v1005_v50 = vpack.c.bf16 %v671_v49, %v668_v46 }
 0x26e   : > { %1026 = vst [vmem:[%s1734_s27 + $0x28] sm:$0xff] %v1010_v48  }
 0x26f   : > { %1025 = vst [vmem:[%s1734_s27 + $0x20] sm:$0xff] %v1005_v50  }
 0x271   : > { %v1123_v51 = vpop.f32.mrb[12].mxu1 }
 0x272   : > { %v684_v52 = vpop.f32.mrb[13].mxu1 }
 0x273   : > { %v1124_v53 = vpop.f32.mrb[14].mxu1 }
 0x274   : > { %v1020_v54 = vpack.c.bf16 %v1124_v53, %v1123_v51  ;;  %v687_v55 = vpop.f32.mrb[15].mxu1 }
 0x275   : > { %v1015_v56 = vpack.c.bf16 %v687_v55, %v684_v52 }
 0x276   : > { %1028 = vst [vmem:[%s1734_s27 + $0x38] sm:$0xff] %v1020_v54  }
 0x277   : > { %1027 = vst [vmem:[%s1734_s27 + $0x30] sm:$0xff] %v1015_v56  }
 0x278   : > { %1351 = shalt.err (!%p1348_p7)
}
 0x279   : > { %s1352_s3 = scalar_lea.hbm %s1750_s14, 1024  ;;  %s1356_s4 = scalar_lea.hbm %s1844_s13, 4096 }
 0x27a   : > { %p1353_p12 = scmp.ne.s32.totalorder %s1750_s14, %s1352_s3  ;;  %p1357_p5 = scmp.lt.u32.totalorder %s1750_s14, %s1844_s13 }
 0x27b   : > { %p1358_p9 = scmp.lt.u32.totalorder %s1356_s4, %s1352_s3  ;;  %p1360_p4 = scmp.lt.u32.totalorder %s1352_s3, %s1750_s14 }
 0x27c   : > { %p1354_p1 = pnand %p1353_p12, %p1623_p8 }
 0x27d   : > { %p1359_p0 = por %p1358_p9, %p1357_p5 }
 0x27e   : > { %p1355_p2 = pneg %p1354_p1 }
 0x27f   : > { %p1361_p10 = por %p1360_p4, %p1359_p0 }
 0x281   : > { %p1362_p6 = pnand %p1361_p10, %p1355_p2 }
 0x283   : > { %1365 = shalt.err (!%p1362_p6)
}
 0x284   : > { %s1448_s29 = smov 64   ;;  %s1449_s26 = smov 4  }
 0x285   : > { %1135 = dma.vmem_to_hbm [thread:$0]  (%p1623_p8), %s1745_s6, 1024, %s1750_s14, %s780_s23, %s1448_s29, %s1448_s29, %s1449_s26  }
 0x286 PF: > { %s1845_s30 = sld [smem:[#allocation12_spill]]  ;;  %s1846_s11 = sld [smem:[#allocation13_spill]] }
 0x287   : > { %p1157_p11 = scmp.ge.s32.totalorder %s1440_s22, 2 }
 0x28c   : > { %s810_s18 = sand.u32 1, %s1845_s30   ;;  %p1847_p13 = scmp.ne.s32.totalorder %s1846_s11, 0 }
 0x28d   : > { %s811_s19 = scalar_lea.sflag [#allocation4], %s810_s18 }
 0x28e   : > { %p1149_p3 = pnand %p1157_p11, %p1847_p13 }
 0x290   : > { %1407 = dma.done.wait (!%p1149_p3), %s811_s19, 1024  }
 0x291   : > { %1409 = vsyncadd (!%p1149_p3), %s811_s19, 4294966272  ;;  %s21_s22 = sadd.s32 1, %s1440_s22   ;;  %s1848_s8 = sld [smem:[#allocation14_spill]] }
 0x292   : > { %p18_p7 = scmp.ge.s32.totalorder %s21_s22, 6   ;;  %s1849_s15 = smov %s1416_s16 }
 0x293   : > { %s1850_s16 = smov %s1420_s17  ;;  %s1851_s17 = smov %s1636_s1 }
 0x294   : > { %s1852_s18 = smov %s1432_s20  ;;  %s1853_s19 = smov %s1436_s21 }
 0x295   : > { %s1855_s21 = smov %s1861_s10  ;;  %20 = sbr.rel (!%p18_p7) target bundleno = 12 (0xc), region = 89 }
 0x297   : > { %s1854_s20 = smov %s1848_s8 }
 0x29c   :  { %816 = vsyncpa [#allocation3], 1 }
 0x29d   :  { %818 = vsyncpa [#allocation3 + $0x1], 1 }
 0x29e   :  { %819 = vsyncpa [#allocation6], 1 }
 0x29f   :  { %820 = vsyncpa [#allocation4], 1 }
 0x2a0   :  { %822 = vsyncpa [#allocation4 + $0x1], 1 }

// kernel: tpu_custom_call.1
= control target key start
LH: loop header
LB: loop body
LE: loop exit
PB: predicated region body
PF: predicated region fallthrough
CT: control target
= control target key end

     0   :  { %s1806_s0 = inlined_call_operand.hbm [shape: bf16[2,256,128], index: 0, kind: input, shape index: {}]   ;;  %s1807_s1 = inlined_call_operand.hbm [shape: bf16[128,128], index: 1, kind: input, shape index: {}]   ;;  %s1808_s2 = inlined_call_operand.vmem [shape: f32[1,128], index: 2, kind: input, shape index: {}]   ;;  %s1809_s3 = inlined_call_operand.hbm [shape: bf16[128,128], index: 3, kind: input, shape index: {}]   ;;  %s1810_s4 = inlined_call_operand.hbm [shape: bf16[2,256,128], index: 4, kind: output, shape index: {}]  }
   0x1   :  { %1821 = sst [smem:[#allocation15_spill]] %s1807_s1 }
   0x2   :  { %1822 = sst [smem:[#allocation16_spill]] %s1809_s3 }
   0x3   :  { %1823 = sst [smem:[#allocation17_spill]] %s1810_s4 }
   0x4   :  { %9 = vsyncpa [#allocation3], 0 }
   0x5   :  { %11 = vsyncpa [#allocation3 + $0x1], 0 }
   0x6   :  { %12 = vsyncpa [#allocation6], 0 }
   0x7   :  { %13 = vsyncpa [#allocation4], 0 }
   0x8   :  { %15 = vsyncpa [#allocation4 + $0x1], 0  ;;  %s1475_s15 = smov 0   ;;  %s1477_s16 = smov 0  }
   0x9   :  { %s1479_s17 = smov 0   ;;  %s1481_s18 = smov 0  }
   0xa   :  { %s1483_s19 = smov 0   ;;  %s1485_s20 = smov 0  }
   0xb   :  { %s1487_s21 = smov 0   ;;  %s1489_s22 = smov 0  }
   0xc LB: > { %1824 = sst [smem:[#allocation12_spill]] %s1412_s15  ;;  %s904_s23 = sadd.s32 4294967295, %s1440_s22   ;;  %s1440_s22 = sphi %s1489_s22, %s21_s22   ;;  %s1436_s21 = sphi %s1487_s21, %s1855_s21   ;;  %s1432_s20 = sphi %s1485_s20, %s1854_s20   ;;  %s1428_s19 = sphi %s1483_s19, %s1853_s19   ;;  %s1424_s18 = sphi %s1481_s18, %s1852_s18   ;;  %s1420_s17 = sphi %s1479_s17, %s1851_s17   ;;  %s1416_s16 = sphi %s1477_s16, %s1850_s16   ;;  %s1412_s15 = sphi %s1475_s15, %s1849_s15  }
   0xd   : > { %s905_s24 = sadd.s32 4294967294, %s1440_s22   ;;  %p55_p0 = scmp.ne.s32.totalorder %s1416_s16, %s1412_s15 }
   0xe   : > { %p1519_p1 = scmp.eq.s32.totalorder %s904_s23, 0  ;;  %p1523_p2 = scmp.eq.s32.totalorder %s904_s23, 3 }
   0xf   : > { %p150_p3 = scmp.eq.s32.totalorder %s905_s24, 3  ;;  %p906_p5 = scmp.ge.s32.totalorder %s1440_s22, 1 }
  0x10   : > { %s1825_s25 = scalar_select %p1519_p1, 1, 0 }
  0x11   : > { %s1826_s26 = scalar_select %p1523_p2, 1, 0 }
  0x12   : > { %p1529_p4 = por %p1519_p1, %p55_p0  ;;  %p1534_p6 = por %p150_p3, %p55_p0 }
  0x13   : > { %p157_p7 = scmp.lt.s32.totalorder %s1440_s22, 5  ;;  %s1442_s30 = smov [#allocation5]  }
  0x14   : > { %s1827_s27 = scalar_select %p1529_p4, 1, 0 }
  0x15   : > { %s1828_s28 = scalar_select %p1534_p6, 1, 0 }
  0x16   : > { %p1539_p8 = pnand %p906_p5, %p157_p7  ;;  %s169_s5 = sshll.u32 %s1442_s30, 4  ;;  %s170_s5 = int_to_ptr.vmem [resolvable:$true] %s169_s5 }
  0x17   : > { %1829 = sst [smem:[#allocation13_spill]] %s1828_s28  ;;  %s1443_s7 = smov [#allocation7]  }
  0x18   : > { %s1830_s29 = scalar_select %p1539_p8, 1, 0 }
  0x19   : > { %p1137_p9 = pneg %p1539_p8  ;;  %s185_s8 = sshll.u32 %s1443_s7, 4  ;;  %s1551_s8 = int_to_ptr.vmem [resolvable:$true] %s185_s8 }
  0x1a   : > { %s1832_s1 = sld [smem:[#allocation15_spill]] }
  0x1b   : > { %p1547_p10 = pnand %p1137_p9, %p1519_p1 }
  0x1d   : > { %p1254_p12 = pneg %p1547_p10 }
  0x20   : > { %s1252_s11 = scalar_lea.hbm %s1832_s1, 1024 }
  0x21   : > { %p1253_p11 = scmp.ne.s32.totalorder %s1832_s1, %s1252_s11  ;;  %p1259_p3 = scmp.lt.u32.totalorder %s1252_s11, %s1832_s1 }
  0x23   : > { %p1255_p13 = pnand %p1254_p12, %p1253_p11 }
  0x25   : > { %p1256_p0 = pneg %p1255_p13 }
  0x27   : > { %p1261_p5 = pnand %p1259_p3, %p1256_p0 }
  0x29   : > { %1264 = shalt.err (!%p1261_p5)
}
  0x2a   : > { %s1265_s24 = scalar_lea.vmem %s170_s5, 1024  ;;  %p1273_p1 = scmp.lt.s32.totalorder %s170_s5, %s170_s5 }
  0x2b   : > { %p1266_p7 = scmp.ne.s32.totalorder %s170_s5, %s1265_s24  ;;  %p1274_p4 = scmp.lt.s32.totalorder %s1265_s24, %s1265_s24 }
  0x2d   : > { %p1268_p9 = pnand %p1266_p7, %p1254_p12  ;;  %p1275_p8 = por %p1274_p4, %p1273_p1 }
  0x2f   : > { %p1269_p6 = pneg %p1268_p9 }
  0x31   : > { %p1276_p2 = pnand %p1275_p8, %p1269_p6 }
  0x33   : > { %1279 = shalt.err (!%p1276_p2)
}
  0x34   : > { %s1816_s30 = smov 64   ;;  %s1817_s7 = smov 4  }
  0x35   : > { %1140 = dma.hbm_to_vmem [thread:$0]  (!%p1547_p10), %s1832_s1, 1024, %s170_s5, [#allocation6], %s1816_s30, %s1816_s30, %s1817_s7  }
  0x36   : > { %s1833_s3 = sld [smem:[#allocation16_spill]] }
  0x3c   : > { %s1280_s13 = scalar_lea.hbm %s1833_s3, 1024 }
  0x3d   : > { %p1281_p1 = scmp.ne.s32.totalorder %s1833_s3, %s1280_s13  ;;  %p1287_p6 = scmp.lt.u32.totalorder %s1280_s13, %s1833_s3 }
  0x3f   : > { %p1283_p2 = pnand %p1281_p1, %p1254_p12 }
  0x41   : > { %p1284_p4 = pneg %p1283_p2 }
  0x43   : > { %p1289_p8 = pnand %p1287_p6, %p1284_p4 }
  0x45   : > { %1292 = shalt.err (!%p1289_p8)
}
  0x46   : > { %s1293_s5 = scalar_lea.vmem %s1551_s8, 1024  ;;  %p1301_p3 = scmp.lt.s32.totalorder %s1551_s8, %s1551_s8 }
  0x47   : > { %p1294_p11 = scmp.ne.s32.totalorder %s1551_s8, %s1293_s5  ;;  %p1302_p5 = scmp.lt.s32.totalorder %s1293_s5, %s1293_s5 }
  0x49   : > { %p1296_p13 = pnand %p1294_p11, %p1254_p12  ;;  %p1303_p7 = por %p1302_p5, %p1301_p3 }
  0x4b   : > { %p1297_p0 = pneg %p1296_p13 }
  0x4d   : > { %p1304_p9 = pnand %p1303_p7, %p1297_p0 }
  0x4f   : > { %1307 = shalt.err (!%p1304_p9)
}
  0x50   : > { %1143 = dma.hbm_to_vmem [thread:$0]  (!%p1547_p10), %s1833_s3, 1024, %s1551_s8, [#allocation6], %s1816_s30, %s1816_s30, %s1817_s7  }
  0x51   : > { %s30_s6 = sadd.s32 1, %s1432_s20  ;;  %s33_s10 = sadd.s32 1, %s1436_s21 }
  0x52   : > { %p31_p12 = scmp.ge.s32.totalorder %s30_s6, 2  ;;  %s42_s11 = sadd.s32 1, %s1420_s17 }
  0x53   : > { %p49_p1 = scmp.ne.s32.totalorder %s1420_s17, %s1416_s16  ;;  %p50_p2 = scmp.eq.s32.totalorder %s1440_s22, 0 }
  0x54   : > { %s1857_s6 = smov (%p31_p12, %s30_s6), 0  ;;  %s1859_s10 = smov (!%p31_p12, %s33_s10), %s1436_s21 }
  0x55   : > { %1834 = sst [smem:[#allocation14_spill]] %s1857_s6  ;;  %s38_s12 = ssub.s32 %s1432_s20, %s1857_s6 }
  0x56   : > { %p1617_p4 = por %p50_p2, %p49_p1  ;;  %p35_p10 = scmp.ge.s32.totalorder %s1859_s10, 2 }
  0x57   : > { %p1836_p6 = scmp.ne.s32.totalorder %s1826_s26, 0  ;;  %p1154_p11 = scmp.lt.s32.totalorder %s1440_s22, 4 }
  0x58   : > { %s199_s14 = sand.u32 1, %s1420_s17   ;;  %s1861_s10 = smov (%p35_p10, %s1859_s10), 0 }
  0x59   : > { %p1623_p8 = por %p1836_p6, %p49_p1  ;;  %s910_s23 = sshll.u32 %s199_s14, 6 }
  0x5a   : > { %s37_s24 = ssub.s32 %s1436_s21, %s1861_s10  ;;  %s911_s28 = sshll.u32 %s1432_s20, 4 }
  0x5b   : > { %s39_s5 = sor.u32 %s38_s12, %s37_s24  ;;  %s912_s9 = sshll.u32 %s1436_s21, 5 }
  0x5c   : > { %p40_p13 = scmp.eq.s32.totalorder %s39_s5, 0  ;;  %s209_s30 = sadd.s32 %s912_s9, %s911_s28 }
  0x5d   : > { %s203_s7 = scalar_lea.vmem [#allocation2], %s910_s23  ;;  %s913_s3 = sshll.u32 %s209_s30, 6 }
  0x5e   : > { %s212_s26 = sshll.u32 %s203_s7, 4  ;;  %s1643_s4 = scalar_lea.hbm %s1806_s0, %s913_s3  ;;  %s1638_s26 = int_to_ptr.vmem [resolvable:$true] %s212_s26 }
  0x5f   : > { %s1636_s1 = scalar_select %p40_p13, %s1420_s17, %s42_s11  }
  0x60   : > { %p1649_p0 = pnand %p1154_p11, %p1617_p4  ;;  %s1653_s30 = scalar_lea.sflag [#allocation3], %s199_s14 }
  0x61   : > { %s1308_s7 = scalar_lea.hbm %s1643_s4, 1024  ;;  %s1313_s6 = scalar_lea.hbm %s1806_s0, 4096 }
  0x62   : > { %p1309_p3 = scmp.ne.s32.totalorder %s1643_s4, %s1308_s7  ;;  %p1310_p5 = pneg %p1649_p0 }
  0x63   : > { %p1314_p12 = scmp.lt.u32.totalorder %s1643_s4, %s1806_s0  ;;  %p1315_p1 = scmp.lt.u32.totalorder %s1313_s6, %s1308_s7 }
  0x64   : > { %p1311_p7 = pnand %p1310_p5, %p1309_p3  ;;  %p1317_p4 = scmp.lt.u32.totalorder %s1308_s7, %s1643_s4 }
  0x65   : > { %p1316_p2 = por %p1315_p1, %p1314_p12 }
  0x66   : > { %p1312_p9 = pneg %p1311_p7 }
  0x67   : > { %p1318_p10 = por %p1317_p4, %p1316_p2 }
  0x69   : > { %p1319_p6 = pnand %p1318_p10, %p1312_p9 }
  0x6b   : > { %1322 = shalt.err (!%p1319_p6)
}
  0x6c   : > { %s1323_s14 = scalar_lea.vmem %s1638_s26, 1024  ;;  %s1446_s23 = smov [#allocation2]  }
  0x6d   : > { %p1324_p11 = scmp.ne.s32.totalorder %s1638_s26, %s1323_s14  ;;  %s1328_s24 = sshll.u32 %s1446_s23, 4  ;;  %s1329_s24 = int_to_ptr.vmem [resolvable:$false] %s1328_s24 }
  0x6e   : > { %s1330_s5 = scalar_lea.vmem %s1329_s24, 2048  ;;  %p1331_p7 = scmp.lt.s32.totalorder %s1638_s26, %s1329_s24 }
  0x6f   : > { %p1326_p13 = pnand %p1324_p11, %p1310_p5  ;;  %p1332_p12 = scmp.lt.s32.totalorder %s1330_s5, %s1323_s14 }
  0x71   : > { %p1327_p3 = pneg %p1326_p13  ;;  %p1333_p1 = por %p1332_p12, %p1331_p7 }
  0x73   : > { %p1334_p2 = pnand %p1333_p1, %p1327_p3 }
  0x75   : > { %1337 = shalt.err (!%p1334_p2)
}
  0x76   : > { %s1839_s28 = smov 4   ;;  %s1840_s9 = smov 64  }
  0x77   : > { %1147 = dma.hbm_to_vmem [thread:$0]  (!%p1649_p0), %s1643_s4, 1024, %s1638_s26, %s1653_s30, %s1840_s9, %s1840_s9, %s1839_s28  }
  0x78   : > { %p1841_p5 = scmp.ne.s32.totalorder %s1830_s29, 0 }
  0x79   : > { %s1687_s7 = sand.u32 (!%p1841_p5), 1, %s1416_s16   ;;  %p1842_p9 = scmp.ne.s32.totalorder (!%p1841_p5), %s1827_s27, 0 }
  0x7a   : > { %224 = sbr.rel (%p1841_p5) target bundleno = 646 (0x286), region = 36  ;;  %s915_s3 = sshll.u32 (!%p1841_p5), %s1687_s7, 6 }
  0x7b   : > { %s227_s15 = scalar_lea.sflag (!%p1841_p5), [#allocation3], %s1687_s7  ;;  %s1693_s12 = scalar_lea.vmem (!%p1841_p5), [#allocation2], %s915_s3 }
  0x81   : > { %1399 = dma.done.wait (%p1842_p9), %s227_s15, 1024  }
  0x82   : > { %1401 = vsyncadd (%p1842_p9), %s227_s15, 4294966272  ;;  %p1843_p0 = scmp.ne.s32.totalorder %s1825_s25, 0 }
  0x84   : > { %1403 = dma.done.wait (%p1843_p0), [#allocation6], 2048  }
  0x85   : > { %1405 = vsyncadd (%p1843_p0), [#allocation6], 4294965248  ;;  %v1228_v0 = vld [vmem:[#allocation5] sm:$0xff]   ;;  %v1229_v1 = vld [vmem:[#allocation5 + $0x8] sm:$0xff]   ;;  %s1734_s27 = scalar_lea.vmem [#allocation8], %s915_s3  ;;  %s961_s29 = sshll.u32 %s1424_s18, 4 }
  0x86   : > { %1061 = vmatprep.subr.bf16.mxu0 %v1228_v0  ;;  %v1230_v2 = vld [vmem:[#allocation5 + $0x10] sm:$0xff]   ;;  %v1231_v3 = vld [vmem:[#allocation5 + $0x18] sm:$0xff]   ;;  %v1236_v4 = vld [vmem:[%s1693_s12] sm:$0xff]   ;;  %s962_s26 = sshll.u32 %s1428_s19, 5  ;;  %s795_s6 = sshll.u32 %s1734_s27, 4  ;;  %s1745_s6 = int_to_ptr.vmem [resolvable:$true] %s795_s6 }
  0x87   : > { %1062 = vmatpush3.bf16.msra.mxu0 %v1228_v0  ;;  %1077 = vmatprep.mubr.bf16.mxu0 %v1236_v4  ;;  %v1232_v5 = vld [vmem:[#allocation5 + $0x20] sm:$0xff]   ;;  %v1233_v6 = vld [vmem:[#allocation5 + $0x28] sm:$0xff]   ;;  %v1234_v9 = vld [vmem:[#allocation5 + $0x30] sm:$0xff]   ;;  %s792_s30 = sadd.s32 %s962_s26, %s961_s29  ;;  %s1844_s13 = sld [smem:[#allocation17_spill]] }
  0x88   : > { %1063 = vmatprep.subr.bf16.mxu0 %v1229_v1  ;;  %v1244_v7 = vld [vmem:[#allocation7] sm:$0xff]   ;;  %v1245_v8 = vld [vmem:[#allocation7 + $0x8] sm:$0xff]   ;;  %v1246_v10 = vld [vmem:[#allocation7 + $0x10] sm:$0xff]   ;;  %s963_s11 = sshll.u32 %s792_s30, 6  ;;  %s780_s23 = scalar_lea.sflag [#allocation4], %s1687_s7 }
  0x89   : > { %1093 = vmatprep.subr.bf16.mxu1 %v1244_v7  ;;  %v1235_v11 = vld [vmem:[#allocation5 + $0x38] sm:$0xff]   ;;  %v1248_v13 = vld [vmem:[#allocation7 + $0x20] sm:$0xff]   ;;  %v1237_v14 = vld [vmem:[%s1693_s12 + $0x8] sm:$0xff]   ;;  %s1338_s24 = scalar_lea.vmem %s1745_s6, 1024  ;;  %s1447_s5 = smov [#allocation8]  }
  0x8a   : > { %1094 = vmatpush3.bf16.msra.mxu1 %v1244_v7  ;;  %v1247_v12 = vld [vmem:[#allocation7 + $0x18] sm:$0xff]   ;;  %v1238_v15 = vld [vmem:[%s1693_s12 + $0x10] sm:$0xff]   ;;  %v1240_v17 = vld [vmem:[%s1693_s12 + $0x20] sm:$0xff]   ;;  %p1339_p4 = scmp.ne.s32.totalorder %s1745_s6, %s1338_s24  ;;  %s1342_s28 = sshll.u32 %s1447_s5, 4  ;;  %s1343_s28 = int_to_ptr.vmem [resolvable:$false] %s1342_s28 }
  0x8b   : > { %1064 = vmatpush3.bf16.msra.mxu0 %v1229_v1  ;;  %1095 = vmatprep.subr.bf16.mxu1 %v1245_v8  ;;  %v1239_v16 = vld [vmem:[%s1693_s12 + $0x18] sm:$0xff]   ;;  %v1241_v18 = vld [vmem:[%s1693_s12 + $0x28] sm:$0xff]   ;;  %v1242_v19 = vld [vmem:[%s1693_s12 + $0x30] sm:$0xff]   ;;  %s1344_s9 = scalar_lea.vmem %s1343_s28, 2048  ;;  %p1345_p11 = scmp.lt.s32.totalorder %s1745_s6, %s1343_s28 }
  0x8c   : > { %1065 = vmatprep.subr.bf16.mxu0 %v1230_v2  ;;  %v1243_v20 = vld [vmem:[%s1693_s12 + $0x38] sm:$0xff]   ;;  %v1249_v21 = vld [vmem:[#allocation7 + $0x28] sm:$0xff]   ;;  %v1250_v22 = vld [vmem:[#allocation7 + $0x30] sm:$0xff]   ;;  %p1340_p10 = pnand %p1339_p4, %p1623_p8  ;;  %p1346_p13 = scmp.lt.s32.totalorder %s1344_s9, %s1338_s24 }
  0x8d   : > { %v1251_v23 = vld [vmem:[#allocation7 + $0x38] sm:$0xff]   ;;  %v1714_v24 = vld [vmem:[%s1808_s2] ss:$0 sm:$0xff]  ;;  %s1750_s14 = scalar_lea.hbm %s1844_s13, %s963_s11 }
  0x8e   : > { %1096 = vmatpush3.bf16.msra.mxu1 %v1245_v8  ;;  %p1341_p6 = pneg %p1340_p10  ;;  %p1347_p3 = por %p1346_p13, %p1345_p11 }
  0x8f   : > { %1066 = vmatpush3.bf16.msra.mxu0 %v1230_v2  ;;  %1097 = vmatprep.subr.bf16.mxu1 %v1246_v10 }
  0x90   : > { %1067 = vmatprep.subr.bf16.mxu0 %v1231_v3  ;;  %p1348_p7 = pnand %p1347_p3, %p1341_p6 }
  0x92   : > { %1098 = vmatpush3.bf16.msra.mxu1 %v1246_v10 }
  0x93   : > { %1068 = vmatpush3.bf16.msra.mxu0 %v1231_v3  ;;  %1099 = vmatprep.subr.bf16.mxu1 %v1247_v12 }
  0x94   : > { %1069 = vmatprep.subr.bf16.mxu0 %v1232_v5 }
  0x96   : > { %1100 = vmatpush3.bf16.msra.mxu1 %v1247_v12 }
  0x97   : > { %1070 = vmatpush3.bf16.msra.mxu0 %v1232_v5  ;;  %1101 = vmatprep.subr.bf16.mxu1 %v1248_v13 }
  0x98   : > { %1071 = vmatprep.subr.bf16.mxu0 %v1233_v6 }
  0x9a   : > { %1102 = vmatpush3.bf16.msra.mxu1 %v1248_v13 }
  0x9b   : > { %1072 = vmatpush3.bf16.msra.mxu0 %v1233_v6  ;;  %1103 = vmatprep.subr.bf16.mxu1 %v1249_v21 }
  0x9c   : > { %1073 = vmatprep.subr.bf16.mxu0 %v1234_v9 }
  0x9e   : > { %1104 = vmatpush3.bf16.msra.mxu1 %v1249_v21 }
  0x9f   : > { %1074 = vmatpush3.bf16.msra.mxu0 %v1234_v9  ;;  %1105 = vmatprep.subr.bf16.mxu1 %v1250_v22 }
  0xa0   : > { %1075 = vmatprep.subr.bf16.mxu0 %v1235_v11 }
  0xa2   : > { %1106 = vmatpush3.bf16.msra.mxu1 %v1250_v22 }
  0xa3   : > { %1076 = vmatpush3.bf16.msra.mxu0 %v1235_v11  ;;  %1107 = vmatprep.subr.bf16.mxu1 %v1251_v23 }
  0xa6   : > { %1078 = vmatmul.mubr.bf16.vlgmr.msra.gmra.mrb[0].mxu0 %v1237_v14  ;;  %1108 = vmatpush3.bf16.msra.mxu1 %v1251_v23 }
  0xa7   : > { %1081 = vmatprep.mubr.bf16.mxu0 %v1238_v15 }
  0xae   : > { %1082 = vmatmul.mubr.bf16.gmra.mrb[4].mxu0 %v1239_v16 }
  0xaf   : > { %1085 = vmatprep.mubr.bf16.mxu0 %v1240_v17 }
  0xb6   : > { %1086 = vmatmul.mubr.bf16.gmra.mrb[8].mxu0 %v1241_v18 }
  0xb7   : > { %1089 = vmatprep.mubr.bf16.mxu0 %v1242_v19 }
  0xbe   : > { %1090 = vmatmul.mubr.bf16.gmra.mrb[12].mxu0 %v1243_v20 }
 0x179   : > { %v1079_v25 = vpop.f32.mrb[0].mxu0 }
 0x17a   : > { %v460_v26 = vadd.f32 %v1079_v25, %v1714_v24  ;;  %v451_v27 = vpop.f32.mrb[1].mxu0 }
 0x17b   : > { %v452_v28 = vadd.f32 %v1714_v24, %v451_v27  ;;  %v1080_v29 = vpop.f32.mrb[2].mxu0 }
 0x17c   : > { %v516_v30 = vmul.f32 0.1, %v460_v26  ;;  %v463_v31 = vadd.f32 %v1080_v29, %v1714_v24  ;;  %v454_v32 = vpop.f32.mrb[3].mxu0 }
 0x17d   : > { %v514_v33 = vmul.f32 0.1, %v452_v28  ;;  %v455_v34 = vadd.f32 %v1714_v24, %v454_v32 }
 0x17e   : > { %v517_v35 = vmul.f32 0.1, %v463_v31  ;;  %v532_v37 = vmax.f32 %v460_v26, %v516_v30 }
 0x17f   : > { %v515_v36 = vmul.f32 0.1, %v455_v34  ;;  %v530_v40 = vmax.f32 %v452_v28, %v514_v33 }
 0x180   : > { %v533_v38 = vmax.f32 %v463_v31, %v517_v35 }
 0x181   : > { %v1083_v39 = vpop.f32.mrb[4].mxu0  ;;  %v531_v41 = vmax.f32 %v455_v34, %v515_v36 }
 0x182   : > { %v476_v42 = vadd.f32 %v1083_v39, %v1714_v24  ;;  %v467_v43 = vpop.f32.mrb[5].mxu0  ;;  %v547_v44 = vpack.c.bf16 %v533_v38, %v532_v37 }
 0x183   : > { %v468_v45 = vadd.f32 %v1714_v24, %v467_v43  ;;  %v1084_v46 = vpop.f32.mrb[6].mxu0  ;;  %v546_v47 = vpack.c.bf16 %v531_v41, %v530_v40 }
 0x184   : > { %v520_v48 = vmul.f32 0.1, %v476_v42  ;;  %v479_v49 = vadd.f32 %v1084_v46, %v1714_v24  ;;  %v470_v50 = vpop.f32.mrb[7].mxu0 }
 0x185   : > { %v518_v51 = vmul.f32 0.1, %v468_v45  ;;  %v471_v52 = vadd.f32 %v1714_v24, %v470_v50  ;;  %1109 = vmatprep.mubr.bf16.mxu1 %v546_v47 }
 0x186   : > { %v521_v53 = vmul.f32 0.1, %v479_v49  ;;  %1110 = vmatmul.mubr.bf16.vlgmr.msra.gmra.mrb[0].mxu1 %v547_v44  ;;  %v536_v55 = vmax.f32 %v476_v42, %v520_v48 }
 0x187   : > { %v519_v54 = vmul.f32 0.1, %v471_v52  ;;  %v534_v57 = vmax.f32 %v468_v45, %v518_v51 }
 0x188   : > { %v537_v56 = vmax.f32 %v479_v49, %v521_v53 }
 0x189   : > { %v535_v58 = vmax.f32 %v471_v52, %v519_v54  ;;  %v1087_v59 = vpop.f32.mrb[8].mxu0 }
 0x18a   : > { %v492_v60 = vadd.f32 %v1087_v59, %v1714_v24  ;;  %v483_v61 = vpop.f32.mrb[9].mxu0  ;;  %v549_v62 = vpack.c.bf16 %v537_v56, %v536_v55 }
 0x18b   : > { %v484_v63 = vadd.f32 %v1714_v24, %v483_v61  ;;  %v1088_v0 = vpop.f32.mrb[10].mxu0  ;;  %v548_v1 = vpack.c.bf16 %v535_v58, %v534_v57 }
 0x18c   : > { %v524_v2 = vmul.f32 0.1, %v492_v60  ;;  %v495_v3 = vadd.f32 %v1088_v0, %v1714_v24  ;;  %v486_v4 = vpop.f32.mrb[11].mxu0 }
 0x18d   : > { %v522_v5 = vmul.f32 0.1, %v484_v63  ;;  %v487_v6 = vadd.f32 %v1714_v24, %v486_v4  ;;  %1113 = vmatprep.mubr.bf16.mxu1 %v548_v1 }
 0x18e   : > { %v525_v7 = vmul.f32 0.1, %v495_v3  ;;  %1114 = vmatmul.mubr.bf16.gmra.mrb[4].mxu1 %v549_v62  ;;  %v540_v9 = vmax.f32 %v492_v60, %v524_v2 }
 0x18f   : > { %v523_v8 = vmul.f32 0.1, %v487_v6  ;;  %v538_v11 = vmax.f32 %v484_v63, %v522_v5 }
 0x190   : > { %v541_v10 = vmax.f32 %v495_v3, %v525_v7 }
 0x191   : > { %v539_v12 = vmax.f32 %v487_v6, %v523_v8  ;;  %v1091_v13 = vpop.f32.mrb[12].mxu0 }
 0x192   : > { %v508_v14 = vadd.f32 %v1091_v13, %v1714_v24  ;;  %v499_v15 = vpop.f32.mrb[13].mxu0  ;;  %v551_v16 = vpack.c.bf16 %v541_v10, %v540_v9 }
 0x193   : > { %v500_v17 = vadd.f32 %v1714_v24, %v499_v15  ;;  %v1092_v18 = vpop.f32.mrb[14].mxu0  ;;  %v550_v19 = vpack.c.bf16 %v539_v12, %v538_v11 }
 0x194   : > { %v528_v20 = vmul.f32 0.1, %v508_v14  ;;  %v511_v21 = vadd.f32 %v1092_v18, %v1714_v24  ;;  %v502_v22 = vpop.f32.mrb[15].mxu0 }
 0x195   : > { %v526_v23 = vmul.f32 0.1, %v500_v17  ;;  %v503_v25 = vadd.f32 %v1714_v24, %v502_v22  ;;  %1117 = vmatprep.mubr.bf16.mxu1 %v550_v19 }
 0x196   : > { %v529_v26 = vmul.f32 0.1, %v511_v21  ;;  %1118 = vmatmul.mubr.bf16.gmra.mrb[8].mxu1 %v551_v16  ;;  %v544_v28 = vmax.f32 %v508_v14, %v528_v20 }
 0x197   : > { %v527_v27 = vmul.f32 0.1, %v503_v25  ;;  %v542_v30 = vmax.f32 %v500_v17, %v526_v23 }
 0x198   : > { %v545_v29 = vmax.f32 %v511_v21, %v529_v26 }
 0x199   : > { %v543_v31 = vmax.f32 %v503_v25, %v527_v27 }
 0x19a   : > { %v553_v32 = vpack.c.bf16 %v545_v29, %v544_v28 }
 0x19b   : > { %v552_v33 = vpack.c.bf16 %v543_v31, %v542_v30 }
 0x19d   : > { %1121 = vmatprep.mubr.bf16.mxu1 %v552_v33 }
 0x19e   : > { %1122 = vmatmul.mubr.bf16.gmra.mrb[12].mxu1 %v553_v32 }
 0x259   : > { %v1111_v34 = vpop.f32.mrb[0].mxu1 }
 0x25a   : > { %v636_v35 = vpop.f32.mrb[1].mxu1 }
 0x25b   : > { %v1112_v36 = vpop.f32.mrb[2].mxu1 }
 0x25c   : > { %v990_v37 = vpack.c.bf16 %v1112_v36, %v1111_v34  ;;  %v639_v38 = vpop.f32.mrb[3].mxu1 }
 0x25d   : > { %v985_v24 = vpack.c.bf16 %v639_v38, %v636_v35 }
 0x25e   : > { %1022 = vst [vmem:[%s1734_s27 + $0x8] sm:$0xff] %v990_v37  }
 0x25f   : > { %986 = vst [vmem:[%s1734_s27] sm:$0xff] %v985_v24  }
 0x261   : > { %v1115_v39 = vpop.f32.mrb[4].mxu1 }
 0x262   : > { %v652_v40 = vpop.f32.mrb[5].mxu1 }
 0x263   : > { %v1116_v41 = vpop.f32.mrb[6].mxu1 }
 0x264   : > { %v1000_v42 = vpack.c.bf16 %v1116_v41, %v1115_v39  ;;  %v655_v43 = vpop.f32.mrb[7].mxu1 }
 0x265   : > { %v995_v44 = vpack.c.bf16 %v655_v43, %v652_v40 }
 0x266   : > { %1024 = vst [vmem:[%s1734_s27 + $0x18] sm:$0xff] %v1000_v42  }
 0x267   : > { %1023 = vst [vmem:[%s1734_s27 + $0x10] sm:$0xff] %v995_v44  }
 0x269   : > { %v1119_v45 = vpop.f32.mrb[8].mxu1 }
 0x26a   : > { %v668_v46 = vpop.f32.mrb[9].mxu1 }
 0x26b   : > { %v1120_v47 = vpop.f32.mrb[10].mxu1 }
 0x26c   : > { %v1010_v48 = vpack.c.bf16 %v1120_v47, %v1119_v45  ;;  %v671_v49 = vpop.f32.mrb[11].mxu1 }
 0x26d   : > { %v1005_v50 = vpack.c.bf16 %v671_v49, %v668_v46 }
 0x26e   : > { %1026 = vst [vmem:[%s1734_s27 + $0x28] sm:$0xff] %v1010_v48  }
 0x26f   : > { %1025 = vst [vmem:[%s1734_s27 + $0x20] sm:$0xff] %v1005_v50  }
 0x271   : > { %v1123_v51 = vpop.f32.mrb[12].mxu1 }
 0x272   : > { %v684_v52 = vpop.f32.mrb[13].mxu1 }
 0x273   : > { %v1124_v53 = vpop.f32.mrb[14].mxu1 }
 0x274   : > { %v1020_v54 = vpack.c.bf16 %v1124_v53, %v1123_v51  ;;  %v687_v55 = vpop.f32.mrb[15].mxu1 }
 0x275   : > { %v1015_v56 = vpack.c.bf16 %v687_v55, %v684_v52 }
 0x276   : > { %1028 = vst [vmem:[%s1734_s27 + $0x38] sm:$0xff] %v1020_v54  }
 0x277   : > { %1027 = vst [vmem:[%s1734_s27 + $0x30] sm:$0xff] %v1015_v56  }
 0x278   : > { %1351 = shalt.err (!%p1348_p7)
}
 0x279   : > { %s1352_s3 = scalar_lea.hbm %s1750_s14, 1024  ;;  %s1356_s4 = scalar_lea.hbm %s1844_s13, 4096 }
 0x27a   : > { %p1353_p12 = scmp.ne.s32.totalorder %s1750_s14, %s1352_s3  ;;  %p1357_p5 = scmp.lt.u32.totalorder %s1750_s14, %s1844_s13 }
 0x27b   : > { %p1358_p9 = scmp.lt.u32.totalorder %s1356_s4, %s1352_s3  ;;  %p1360_p4 = scmp.lt.u32.totalorder %s1352_s3, %s1750_s14 }
 0x27c   : > { %p1354_p1 = pnand %p1353_p12, %p1623_p8 }
 0x27d   : > { %p1359_p0 = por %p1358_p9, %p1357_p5 }
 0x27e   : > { %p1355_p2 = pneg %p1354_p1 }
 0x27f   : > { %p1361_p10 = por %p1360_p4, %p1359_p0 }
 0x281   : > { %p1362_p6 = pnand %p1361_p10, %p1355_p2 }
 0x283   : > { %1365 = shalt.err (!%p1362_p6)
}
 0x284   : > { %s1448_s29 = smov 64   ;;  %s1449_s26 = smov 4  }
 0x285   : > { %1135 = dma.vmem_to_hbm [thread:$0]  (%p1623_p8), %s1745_s6, 1024, %s1750_s14, %s780_s23, %s1448_s29, %s1448_s29, %s1449_s26  }
 0x286 PF: > { %s1845_s30 = sld [smem:[#allocation12_spill]]  ;;  %s1846_s11 = sld [smem:[#allocation13_spill]] }
 0x287   : > { %p1157_p11 = scmp.ge.s32.totalorder %s1440_s22, 2 }
 0x28c   : > { %s810_s18 = sand.u32 1, %s1845_s30   ;;  %p1847_p13 = scmp.ne.s32.totalorder %s1846_s11, 0 }
 0x28d   : > { %s811_s19 = scalar_lea.sflag [#allocation4], %s810_s18 }
 0x28e   : > { %p1149_p3 = pnand %p1157_p11, %p1847_p13 }
 0x290   : > { %1407 = dma.done.wait (!%p1149_p3), %s811_s19, 1024  }
 0x291   : > { %1409 = vsyncadd (!%p1149_p3), %s811_s19, 4294966272  ;;  %s21_s22 = sadd.s32 1, %s1440_s22   ;;  %s1848_s8 = sld [smem:[#allocation14_spill]] }
 0x292   : > { %p18_p7 = scmp.ge.s32.totalorder %s21_s22, 6   ;;  %s1849_s15 = smov %s1416_s16 }
 0x293   : > { %s1850_s16 = smov %s1420_s17  ;;  %s1851_s17 = smov %s1636_s1 }
 0x294   : > { %s1852_s18 = smov %s1432_s20  ;;  %s1853_s19 = smov %s1436_s21 }
 0x295   : > { %s1855_s21 = smov %s1861_s10  ;;  %20 = sbr.rel (!%p18_p7) target bundleno = 12 (0xc), region = 89 }
 0x297   : > { %s1854_s20 = smov %s1848_s8 }
 0x29c   :  { %816 = vsyncpa [#allocation3], 1 }
 0x29d   :  { %818 = vsyncpa [#allocation3 + $0x1], 1 }
 0x29e   :  { %819 = vsyncpa [#allocation6], 1 }
 0x29f   :  { %820 = vsyncpa [#allocation4], 1 }
 0x2a0   :  { %822 = vsyncpa [#allocation4 + $0x1], 1 }

</bundles_post_ra>
